<compile_context>
chip_gen: v7x
topology: tpu7x:2x2x1
jax: 0.10.0
libtpu: 0.0.40
codegen_flags: <defaults>
</compile_context>

<pallas_src>
from functools import partial

import jax
import jax.numpy as jnp
from jax import lax
from jax.experimental import pallas as pl
from jax.experimental.pallas import tpu as pltpu

OUT_W = 128     # packed output width: [policy (P) | value (1) | zero pad]
SLAB_W = 128    # lane width of the packed weight / bias slabs

# Fixed row order of the packed (f32) bias slab.
BIAS_ROW = {"b11": 0, "b12": 1, "b21_a1": 2, "b22_a2": 3, "ba3": 4,
            "b31": 5, "b32": 6, "bp2": 7, "bpv": 8}
N_BIAS_ROWS = 16            # padded to a full sublane tile


def sarl_pv_kernel(x_ref, w_ref, b_ref, out_ref, *,
                   n_humans, n_policy, n_h2, inv_n, w_offs, edt):
    f32 = jnp.float32
    cdt = x_ref.dtype                       # matmul operand dtype (bf16)
    c = lambda v: v.astype(cdt)
    relu = lambda v: jnp.maximum(v, 0.0)

    def dot32(a, b):                        # MXU matmul, f32 accumulation
        return jnp.dot(a, b, preferred_element_type=f32)

    def dote(a, b):                         # f32-accumulated matmul, edt result
        return dot32(a, b).astype(edt)

    def W(name):                            # static slice of the VMEM weight slab
        off, r, cols = w_offs[name]
        return w_ref[off:off + r, :cols]

    def bias_e(name, width):
        row = BIAS_ROW[name]
        return b_ref[row:row + 1, :width].astype(edt)

    def lin_e(a, wname, bname):             # Linear layer with edt output
        off, r, cols = w_offs[wname]
        return dote(a, w_ref[off:off + r, :cols]) + bias_e(bname, cols)

    x = x_ref[...]                          # (RB, D) bf16, RB = batch_block * N
    rows = x.shape[0]
    bb = rows // n_humans                   # batches in this block

    # Group-indicator / row-selection masks, generated on the VPU (no HBM DMA).
    r_ids = lax.broadcasted_iota(jnp.int32, (rows, bb), 0)
    c_ids = lax.broadcasted_iota(jnp.int32, (rows, bb), 1)
    lo = c_ids * n_humans
    mask_c = ((r_ids >= lo) & (r_ids < lo + n_humans)).astype(cdt)     # (RB, BB)
    bT = lax.broadcasted_iota(jnp.int32, (bb, rows), 0)
    rT = lax.broadcasted_iota(jnp.int32, (bb, rows), 1)
    loT = bT * n_humans
    in_batch = (rT >= loT) & (rT < loT + n_humans)                     # (BB, RB)
    maskT_f = in_batch.astype(f32)
    maskT_c = in_batch.astype(cdt)
    sel_c = (rT == loT).astype(cdt)         # picks row b*n_humans (the self row)

    # ---- mlp1: Linear->ReLU->Linear->ReLU ----
    h = relu(lin_e(x, "w11", "b11"))
    h1 = relu(lin_e(c(h), "w12", "b12"))                               # (RB, H1)
    h1c = c(h1)

    # ---- global state: per-batch mean of h1, projected BEFORE the broadcast;
    #      wa1g is zero-left-padded so g_proj lands in the attention lanes. ----
    mean_b = dot32(maskT_c, h1c) * inv_n                               # (BB, H1) f32
    gp = dot32(c(mean_b), W("wa1g_p"))                                 # (BB, TW)

    # ---- fused [mlp2 layer1 | attention layer1]: one lane-dense matmul ----
    tw = w_offs["w21_a1"][2]
    t = relu(dote(h1c, W("w21_a1")) + dote(mask_c, c(gp))
             + bias_e("b21_a1", tw))                                   # (RB, TW)

    # ---- fused [mlp2 layer2 | attention layer2]: one lane-dense matmul ----
    u = lin_e(c(t), "w22_a2", "b22_a2")        # (RB, 128): [h2 | att2 | 0]
    h2 = u[:, :n_h2].astype(f32)               # (RB, H2), no ReLU (matches ref)

    # ---- attention scores: zero-padded wa3 rows pick only the att2 lanes ----
    ba3 = BIAS_ROW["ba3"]
    scores = dot32(c(relu(u)), W("wa3_p")) + b_ref[ba3:ba3 + 1, :1]    # (RB, 1) f32
    # TODO(synk): exp with no running-max subtraction and the exact ==0 gate are
    # inherited from the torch reference; they can overflow / be brittle by design.
    scores_exp = jnp.exp(scores) * (scores != 0.0).astype(f32)

    denom = dot32(maskT_f, scores_exp)                                 # (BB, 1)
    weighted = dot32(maskT_f, scores_exp * h2)                         # (BB, H2)
    weighted = weighted * pl.reciprocal(denom, approx=True)
    # TODO(synk): self.attention_weights numpy/.cpu() side effect not emitted.

    # ---- self state: 0/1 selection matmul over the resident x tile; zero-padded
    #      rows of w3s mask off the human-feature columns exactly. ----
    self_x = dot32(sel_c, x)                                           # (BB, D)

    # ---- mlp3 + linear_p_2 + relu ----
    j = relu(dote(c(self_x), W("w3s_p")) + dote(c(weighted), W("w3f"))
             + bias_e("b31", w_offs["w3f"][2]))
    j = relu(lin_e(c(j), "w32", "b32"))
    j = relu(lin_e(c(j), "wp2", "bp2"))                                # (BB, M3)

    # ---- fused heads: one lane-dense matmul for [linear_p_1 | linear_v | pad] ----
    bpv = BIAS_ROW["bpv"]
    head = dot32(c(j), W("wpv")) + b_ref[bpv:bpv + 1, :]               # (BB, 128) f32
    col = lax.broadcasted_iota(jnp.int32, head.shape, 1)
    is_pol = col < n_policy
    logits = jnp.where(is_pol, head, -jnp.inf)
    m = jnp.max(logits, axis=-1, keepdims=True)
    e = jnp.exp(logits - m)                       # masked lanes -> exp(-inf) = 0
    pol = e * pl.reciprocal(jnp.sum(e, axis=-1, keepdims=True), approx=True)
    out_ref[...] = jnp.where(
        is_pol, pol, jnp.where(col == n_policy, head, 0.0)).astype(out_ref.dtype)


# ---------------- wrapper-side packing / dispatch ----------------

def _elementwise_dtype():
    """bf16 elementwise math on chips with a bf16 VPU/EUP (v6e / v7x); f32 on
    v5e and older where bf16 elementwise would be a pessimization."""
    try:
        kind = jax.devices()[0].device_kind.lower()
    except Exception:
        return jnp.float32
    if any(g in kind for g in ("v2", "v3", "v4", "v5")):
        return jnp.float32
    return jnp.bfloat16


def _pack_slabs(params, *, input_dim, self_dim, cdt):
    """Pack all weights into one lane-padded bf16 slab (fused / zero-padded
    blocks, 16-row aligned offsets) and all biases into one f32 slab."""
    H1 = params["w11"].shape[1]
    H2H = params["w21"].shape[1]
    H2 = params["w22"].shape[1]
    A1 = params["wa1h"].shape[1]
    A2 = params["wa2"].shape[1]
    M1 = params["w3f"].shape[1]
    M3 = params["wp2"].shape[1]
    P = params["wp1"].shape[1]
    TW = H2H + A1                       # width of fused [mlp2-1 | att-1]
    UW = SLAB_W                         # lane-padded width of fused [mlp2-2 | att-2]
    assert TW <= SLAB_W and H2 + A2 <= SLAB_W and P + 1 <= OUT_W

    z = lambda r, cnum: jnp.zeros((r, cnum), jnp.float32)

    w21_a1 = jnp.concatenate([params["w21"], params["wa1h"]], axis=1)        # (H1, TW)
    wa1g_p = z(H1, TW).at[:, H2H:TW].set(params["wa1g"])                     # att lanes only
    w22_a2 = (z(TW, UW).at[:H2H, :H2].set(params["w22"])
                        .at[H2H:TW, H2:H2 + A2].set(params["wa2"]))
    wa3_p = z(UW, 1).at[H2:H2 + A2, :].set(params["wa3"])
    w3s_p = z(input_dim, M1).at[:self_dim, :].set(params["w3s"])
    wpv = (z(M3, OUT_W).at[:, :P].set(params["wp1"])
                       .at[:, P:P + 1].set(params["wv"]))

    blocks = [("w11", params["w11"]), ("w12", params["w12"]),
              ("w21_a1", w21_a1), ("wa1g_p", wa1g_p), ("w22_a2", w22_a2),
              ("wa3_p", wa3_p), ("w3s_p", w3s_p), ("w3f", params["w3f"]),
              ("w32", params["w32"]), ("wp2", params["wp2"]), ("wpv", wpv)]
    parts, w_offs, off = [], {}, 0
    for name, w in blocks:
        r, cnum = w.shape
        rp = r + ((-r) % 16)                   # 16-row (bf16 sublane tile) aligned
        parts.append(jnp.zeros((rp, SLAB_W), jnp.float32).at[:r, :cnum].set(w))
        w_offs[name] = (off, r, cnum)
        off += rp
    w_slab = jnp.concatenate(parts, axis=0).astype(cdt)

    def brow(*pieces):
        r = jnp.zeros((1, SLAB_W), jnp.float32)
        for col0, v in pieces:
            v = jnp.asarray(v, jnp.float32).reshape(1, -1)
            r = r.at[:, col0:col0 + v.shape[1]].set(v)
        return r

    rows = {
        "b11": brow((0, params["b11"])),
        "b12": brow((0, params["b12"])),
        "b21_a1": brow((0, params["b21"]), (H2H, params["ba1"])),
        "b22_a2": brow((0, params["b22"]), (H2, params["ba2"])),
        "ba3": brow((0, params["ba3"])),
        "b31": brow((0, params["b31"])),
        "b32": brow((0, params["b32"])),
        "bp2": brow((0, params["bp2"])),
        "bpv": brow((0, params["bp1"]), (P, params["bv"])),
    }
    bias_slab = jnp.zeros((N_BIAS_ROWS, SLAB_W), jnp.float32)
    for name, r in rows.items():
        bias_slab = bias_slab.at[BIAS_ROW[name]:BIAS_ROW[name] + 1, :].set(r)
    return w_slab, bias_slab, w_offs


def sarl_pv_forward(state, params, *, self_state_dim, batch_block=None):
    """state: (batch, n_humans, state_dim) float32 -> (policies, values)."""
    B, N, D = state.shape
    P = params["wp1"].shape[1]
    cdt = jnp.bfloat16                  # matmul operand dtype
    edt = _elementwise_dtype()          # elementwise dtype (bf16 on v6e/v7x)

    ceil_to = lambda v, m: -(-v // m) * m
    if batch_block is None:
        # ~512 rows per grid step (>=128 so the MXU sees full tiles), batch count
        # a multiple of 16 so RB = batch_block*N is 16-sublane aligned for bf16;
        # capped at ceil16(ceil(B/2)) so the parallel grid axis keeps >= 2 steps
        # (v7x dual TensorCore) whenever the batch allows it.
        batch_block = max(16, min(128, (512 // max(N, 1)) // 16 * 16))
        batch_block = min(batch_block, max(16, ceil_to(ceil_to(B, 2) // 2, 16)))

    Bp = ceil_to(B, batch_block)
    if Bp != B:
        # Pad with copies of the last batch: padded rows stay numerically
        # well-behaved (finite attention denominators) and are sliced off below.
        state = jnp.concatenate(
            [state, jnp.broadcast_to(state[-1:], (Bp - B, N, D))], axis=0)

    x_flat = state.reshape(Bp * N, D).astype(cdt)
    w_slab, bias_slab, w_offs = _pack_slabs(
        params, input_dim=D, self_dim=self_state_dim, cdt=cdt)

    RB = batch_block * N
    grid = (Bp // batch_block,)
    in_specs = [
        pl.BlockSpec((RB, D), lambda i: (i, 0)),            # activations: tiled
        pl.BlockSpec(w_slab.shape, lambda i: (0, 0)),       # weight slab: VMEM-resident
        pl.BlockSpec(bias_slab.shape, lambda i: (0, 0)),    # bias slab: VMEM-resident
    ]
    out_specs = pl.BlockSpec((batch_block, OUT_W), lambda i: (i, 0))

    # Advisory cost estimate for XLA scheduling around the custom call.
    rows = Bp * N
    H1 = params["w11"].shape[1]
    H2 = params["w22"].shape[1]
    TW = w_offs["w21_a1"][2]
    UW = w_offs["w22_a2"][2]
    M1 = params["w3f"].shape[1]
    M2 = params["w32"].shape[1]
    M3 = params["wp2"].shape[1]
    flops = int(2 * rows * (D * H1 + H1 * H1 + H1 * TW + TW * UW + UW)
                + 2 * rows * batch_block * (H1 + TW + 1 + H2 + D)
                + 2 * Bp * (H1 * TW + D * M1 + H2 * M1 + M1 * M2 + M2 * M3
                            + M3 * OUT_W))
    transcendentals = int(rows + Bp * OUT_W + 2 * Bp)
    bytes_accessed = int(x_flat.size * 2 + w_slab.size * 2
                         + bias_slab.size * 4 + Bp * OUT_W * 4)

    kernel = partial(sarl_pv_kernel, n_humans=N, n_policy=P, n_h2=H2,
                     inv_n=1.0 / float(N), w_offs=w_offs, edt=edt)
    out = pl.pallas_call(
        kernel,
        out_shape=jax.ShapeDtypeStruct((Bp, OUT_W), jnp.float32),
        grid=grid,
        in_specs=in_specs,
        out_specs=out_specs,
        compiler_params=pltpu.CompilerParams(
            dimension_semantics=("parallel",),
            vmem_limit_bytes=32 * 1024 * 1024),
        cost_estimate=pl.CostEstimate(
            flops=flops, transcendentals=transcendentals,
            bytes_accessed=bytes_accessed),
    )(x_flat, w_slab, bias_slab)

    pol = out[:B, :P]
    val = out[:B, P:P + 1]
    return pol, val


# ---------------- parameter construction (deterministic, synthetic) ----------------

def _linear(key, fan_in, fan_out):
    kw, kb = jax.random.split(key)
    bound = 1.0 / (fan_in ** 0.5)
    w = jax.random.uniform(kw, (fan_in, fan_out), jnp.float32, -bound, bound)
    b = jax.random.uniform(kb, (1, fan_out), jnp.float32, -bound, bound)
    return w, b


def init_params(key, *, input_dim, self_dim, h1, h2_hidden, h2, a1, a2, m1, m2, m3, p_d):
    keys = jax.random.split(key, 12)
    p = {}
    p["w11"], p["b11"] = _linear(keys[0], input_dim, h1)       # mlp1 layer 1
    p["w12"], p["b12"] = _linear(keys[1], h1, h1)              # mlp1 layer 2
    p["w21"], p["b21"] = _linear(keys[2], h1, h2_hidden)       # mlp2 layer 1
    p["w22"], p["b22"] = _linear(keys[3], h2_hidden, h2)       # mlp2 layer 2
    wa1, p["ba1"] = _linear(keys[4], 2 * h1, a1)               # attention layer 1
    p["wa1h"], p["wa1g"] = wa1[:h1], wa1[h1:]
    p["wa2"], p["ba2"] = _linear(keys[5], a1, a2)
    p["wa3"], p["ba3"] = _linear(keys[6], a2, 1)
    w31, p["b31"] = _linear(keys[7], self_dim + h2, m1)        # mlp3 layer 1
    p["w3s"], p["w3f"] = w31[:self_dim], w31[self_dim:]
    p["w32"], p["b32"] = _linear(keys[8], m1, m2)              # mlp3 layer 2
    p["wp2"], p["bp2"] = _linear(keys[9], m2, m3)              # linear_p_2
    p["wp1"], p["bp1"] = _linear(keys[10], m3, p_d)            # linear_p_1
    p["wv"], p["bv"] = _linear(keys[11], m3, 1)                # linear_v
    return p


# ---------------- pure-JAX reference (mirrors the torch forward) ----------------

def reference_forward(state, params, self_state_dim):
    B, N, D = state.shape
    relu = jax.nn.relu
    x = state.reshape(B * N, D)
    self_state = state[:, 0, :self_state_dim]
    h = relu(x @ params["w11"] + params["b11"])
    h1 = relu(h @ params["w12"] + params["b12"])
    h = relu(h1 @ params["w21"] + params["b21"])
    h2 = h @ params["w22"] + params["b22"]
    g = jnp.mean(h1.reshape(B, N, -1), axis=1, keepdims=True)
    g = jnp.broadcast_to(g, (B, N, h1.shape[-1])).reshape(B * N, -1)
    att_in = jnp.concatenate([h1, g], axis=1)
    wa1 = jnp.concatenate([params["wa1h"], params["wa1g"]], axis=0)
    a = relu(att_in @ wa1 + params["ba1"])
    a = relu(a @ params["wa2"] + params["ba2"])
    scores = (a @ params["wa3"] + params["ba3"]).reshape(B, N)
    scores_exp = jnp.exp(scores) * (scores != 0).astype(jnp.float32)
    weights = (scores_exp / jnp.sum(scores_exp, axis=1, keepdims=True))[:, :, None]
    weighted = jnp.sum(weights * h2.reshape(B, N, -1), axis=1)
    joint = jnp.concatenate([self_state, weighted], axis=1)
    w31 = jnp.concatenate([params["w3s"], params["w3f"]], axis=0)
    j = relu(joint @ w31 + params["b31"])
    j = relu(j @ params["w32"] + params["b32"])
    j = relu(j @ params["wp2"] + params["bp2"])
    pol = jax.nn.softmax(j @ params["wp1"] + params["bp1"], axis=-1)
    val = j @ params["wv"] + params["bv"]
    return pol, val


if __name__ == "__main__":
    # small, forward-consistent shapes (B=12 exercises the batch padding path)
    B, N = 12, 5                    # batch, number of humans
    SELF_DIM, HUMAN_DIM = 6, 7      # rotated self / human state dims (no occupancy map)
    D = SELF_DIM + HUMAN_DIM        # input_dim() = 13
    H1 = 64                         # mlp1_dims = [64, 64]
    H2H, H2 = 64, 32                # mlp2_dims = [64, 32]
    A1, A2 = 64, 64                 # attention_dims = [64, 64, 1], with_global_state=True
    M1, M2, M3 = 64, 64, 64         # mlp3_dims = [64, 64, 64]
    P = 3 * 4 + 1                   # speed_samples * rotation_samples + 1

    key = jax.random.PRNGKey(0)
    k_state, k_params = jax.random.split(key)
    state = jax.random.normal(k_state, (B, N, D), dtype=jnp.float32)

    params = init_params(k_params, input_dim=D, self_dim=SELF_DIM, h1=H1,
                         h2_hidden=H2H, h2=H2, a1=A1, a2=A2,
                         m1=M1, m2=M2, m3=M3, p_d=P)

    pol, val = sarl_pv_forward(state, params, self_state_dim=SELF_DIM)
    jax.block_until_ready((pol, val))

    ref_pol, ref_val = reference_forward(state, params, SELF_DIM)
    assert pol.shape == (B, P) and val.shape == (B, 1)
    pol_err = float(jnp.max(jnp.abs(pol - ref_pol)))
    val_err = float(jnp.max(jnp.abs(val - ref_val)))
    assert pol_err < 5e-2, pol_err                        # bf16 matmuls, f32 accumulation
    assert val_err < 5e-2 * (1.0 + float(jnp.max(jnp.abs(ref_val)))), val_err
    print("KERNEL_OK")
</pallas_src>

<mosaic_0001>
module attributes {stable_mosaic.version = 11 : i64} {
  func.func @sarl_pv_kernel(%arg0: i32, %arg1: memref<80x13xbf16, #tpu.memory_space<vmem>>, %arg2: memref<704x128xbf16, #tpu.memory_space<vmem>>, %arg3: memref<16x128xf32, #tpu.memory_space<vmem>>, %arg4: memref<16x128xf32, #tpu.memory_space<vmem>>) attributes {dimension_semantics = [#tpu.dimension_semantics<parallel>], iteration_bounds = array<i64: 1>, scalar_prefetch = 0 : i64, scratch_operands = 0 : i64, tpu.core_type = #tpu.core_type<tc>, window_params = [{transform_indices = @transform_0, window_bounds = array<i64: 80, 13>}, {pipeline_mode = #tpu.pipeline_mode<synchronous>, transform_indices = @transform_1, window_bounds = array<i64: 704, 128>}, {pipeline_mode = #tpu.pipeline_mode<synchronous>, transform_indices = @transform_2, window_bounds = array<i64: 16, 128>}, {transform_indices = @transform_3, window_bounds = array<i64: 16, 128>}]} {
    %c0 = arith.constant 0 : index
    %c0_0 = arith.constant 0 : index
    %0 = vector.load %arg1[%c0, %c0_0] : memref<80x13xbf16, #tpu.memory_space<vmem>>, vector<80x13xbf16>
    %1 = tpu.iota {dimensions = array<i32: 0>} : vector<80x16xi32>
    %2 = tpu.iota {dimensions = array<i32: 1>} : vector<80x16xi32>
    %c5_i32 = arith.constant 5 : i32
    %3 = vector.broadcast %c5_i32 : i32 to vector<80x16xi32>
    %4 = arith.muli %2, %3 : vector<80x16xi32>
    %5 = arith.cmpi sge, %1, %4 : vector<80x16xi32>
    %c5_i32_1 = arith.constant 5 : i32
    %6 = vector.broadcast %c5_i32_1 : i32 to vector<80x16xi32>
    %7 = arith.addi %4, %6 : vector<80x16xi32>
    %8 = arith.cmpi slt, %1, %7 : vector<80x16xi32>
    %9 = arith.andi %5, %8 : vector<80x16xi1>
    %10 = arith.extui %9 : vector<80x16xi1> to vector<80x16xi32>
    %11 = arith.sitofp %10 : vector<80x16xi32> to vector<80x16xf32>
    %12 = arith.truncf %11 : vector<80x16xf32> to vector<80x16xbf16>
    %13 = tpu.iota {dimensions = array<i32: 0>} : vector<16x80xi32>
    %14 = tpu.iota {dimensions = array<i32: 1>} : vector<16x80xi32>
    %c5_i32_2 = arith.constant 5 : i32
    %15 = vector.broadcast %c5_i32_2 : i32 to vector<16x80xi32>
    %16 = arith.muli %13, %15 : vector<16x80xi32>
    %17 = arith.cmpi sge, %14, %16 : vector<16x80xi32>
    %c5_i32_3 = arith.constant 5 : i32
    %18 = vector.broadcast %c5_i32_3 : i32 to vector<16x80xi32>
    %19 = arith.addi %16, %18 : vector<16x80xi32>
    %20 = arith.cmpi slt, %14, %19 : vector<16x80xi32>
    %21 = arith.andi %17, %20 : vector<16x80xi1>
    %22 = arith.extui %21 : vector<16x80xi1> to vector<16x80xi32>
    %23 = arith.sitofp %22 : vector<16x80xi32> to vector<16x80xf32>
    %24 = arith.extui %21 : vector<16x80xi1> to vector<16x80xi32>
    %25 = arith.sitofp %24 : vector<16x80xi32> to vector<16x80xf32>
    %26 = arith.truncf %25 : vector<16x80xf32> to vector<16x80xbf16>
    %27 = arith.cmpi eq, %14, %16 : vector<16x80xi32>
    %28 = arith.extui %27 : vector<16x80xi1> to vector<16x80xi32>
    %29 = arith.sitofp %28 : vector<16x80xi32> to vector<16x80xf32>
    %30 = arith.truncf %29 : vector<16x80xf32> to vector<16x80xbf16>
    %c0_4 = arith.constant 0 : index
    %c0_5 = arith.constant 0 : index
    %31 = vector.load %arg2[%c0_4, %c0_5] : memref<704x128xbf16, #tpu.memory_space<vmem>>, vector<13x64xbf16>
    %cst = arith.constant dense<0.000000e+00> : vector<80x64xf32>
    %32 = tpu.matmul %0, %31, %cst {dimension_numbers = #tpu.dot_dimension_numbers<[1], [0], [0], [1], [0, 0, 1, 1], [], []>} : vector<80x13xbf16>, vector<13x64xbf16>, vector<80x64xf32> -> vector<80x64xf32>
    %33 = arith.truncf %32 : vector<80x64xf32> to vector<80x64xbf16>
    %c0_6 = arith.constant 0 : index
    %c0_7 = arith.constant 0 : index
    %34 = vector.load %arg3[%c0_6, %c0_7] : memref<16x128xf32, #tpu.memory_space<vmem>>, vector<1x64xf32>
    %35 = arith.truncf %34 : vector<1x64xf32> to vector<1x64xbf16>
    %36 = vector.broadcast %35 : vector<1x64xbf16> to vector<80x64xbf16>
    %37 = arith.addf %33, %36 : vector<80x64xbf16>
    %cst_8 = arith.constant 0.000000e+00 : bf16
    %38 = vector.broadcast %cst_8 : bf16 to vector<80x64xbf16>
    %39 = arith.maximumf %37, %38 : vector<80x64xbf16>
    %c16 = arith.constant 16 : index
    %c0_9 = arith.constant 0 : index
    %40 = vector.load %arg2[%c16, %c0_9] : memref<704x128xbf16, #tpu.memory_space<vmem>>, vector<64x64xbf16>
    %cst_10 = arith.constant dense<0.000000e+00> : vector<80x64xf32>
    %41 = tpu.matmul %39, %40, %cst_10 {dimension_numbers = #tpu.dot_dimension_numbers<[1], [0], [0], [1], [0, 0, 1, 1], [], []>} : vector<80x64xbf16>, vector<64x64xbf16>, vector<80x64xf32> -> vector<80x64xf32>
    %42 = arith.truncf %41 : vector<80x64xf32> to vector<80x64xbf16>
    %c1 = arith.constant 1 : index
    %c0_11 = arith.constant 0 : index
    %43 = vector.load %arg3[%c1, %c0_11] : memref<16x128xf32, #tpu.memory_space<vmem>>, vector<1x64xf32>
    %44 = arith.truncf %43 : vector<1x64xf32> to vector<1x64xbf16>
    %45 = vector.broadcast %44 : vector<1x64xbf16> to vector<80x64xbf16>
    %46 = arith.addf %42, %45 : vector<80x64xbf16>
    %cst_12 = arith.constant 0.000000e+00 : bf16
    %47 = vector.broadcast %cst_12 : bf16 to vector<80x64xbf16>
    %48 = arith.maximumf %46, %47 : vector<80x64xbf16>
    %cst_13 = arith.constant dense<0.000000e+00> : vector<16x64xf32>
    %49 = tpu.matmul %26, %48, %cst_13 {dimension_numbers = #tpu.dot_dimension_numbers<[1], [0], [0], [1], [0, 0, 1, 1], [], []>} : vector<16x80xbf16>, vector<80x64xbf16>, vector<16x64xf32> -> vector<16x64xf32>
    %cst_14 = arith.constant 2.000000e-01 : f32
    %50 = vector.broadcast %cst_14 : f32 to vector<16x64xf32>
    %51 = arith.mulf %49, %50 : vector<16x64xf32>
    %52 = arith.truncf %51 : vector<16x64xf32> to vector<16x64xbf16>
    %c144 = arith.constant 144 : index
    %c0_15 = arith.constant 0 : index
    %53 = vector.load %arg2[%c144, %c0_15] : memref<704x128xbf16, #tpu.memory_space<vmem>>, vector<64x128xbf16>
    %cst_16 = arith.constant dense<0.000000e+00> : vector<16x128xf32>
    %54 = tpu.matmul %52, %53, %cst_16 {dimension_numbers = #tpu.dot_dimension_numbers<[1], [0], [0], [1], [0, 0, 1, 1], [], []>} : vector<16x64xbf16>, vector<64x128xbf16>, vector<16x128xf32> -> vector<16x128xf32>
    %c80 = arith.constant 80 : index
    %c0_17 = arith.constant 0 : index
    %55 = vector.load %arg2[%c80, %c0_17] : memref<704x128xbf16, #tpu.memory_space<vmem>>, vector<64x128xbf16>
    %cst_18 = arith.constant dense<0.000000e+00> : vector<80x128xf32>
    %56 = tpu.matmul %48, %55, %cst_18 {dimension_numbers = #tpu.dot_dimension_numbers<[1], [0], [0], [1], [0, 0, 1, 1], [], []>} : vector<80x64xbf16>, vector<64x128xbf16>, vector<80x128xf32> -> vector<80x128xf32>
    %57 = arith.truncf %56 : vector<80x128xf32> to vector<80x128xbf16>
    %58 = arith.truncf %54 : vector<16x128xf32> to vector<16x128xbf16>
    %cst_19 = arith.constant dense<0.000000e+00> : vector<80x128xf32>
    %59 = tpu.matmul %12, %58, %cst_19 {dimension_numbers = #tpu.dot_dimension_numbers<[1], [0], [0], [1], [0, 0, 1, 1], [], []>} : vector<80x16xbf16>, vector<16x128xbf16>, vector<80x128xf32> -> vector<80x128xf32>
    %60 = arith.truncf %59 : vector<80x128xf32> to vector<80x128xbf16>
    %61 = arith.addf %57, %60 : vector<80x128xbf16>
    %c2 = arith.constant 2 : index
    %c0_20 = arith.constant 0 : index
    %62 = vector.load %arg3[%c2, %c0_20] : memref<16x128xf32, #tpu.memory_space<vmem>>, vector<1x128xf32>
    %63 = arith.truncf %62 : vector<1x128xf32> to vector<1x128xbf16>
    %64 = vector.broadcast %63 : vector<1x128xbf16> to vector<80x128xbf16>
    %65 = arith.addf %61, %64 : vector<80x128xbf16>
    %cst_21 = arith.constant 0.000000e+00 : bf16
    %66 = vector.broadcast %cst_21 : bf16 to vector<80x128xbf16>
    %67 = arith.maximumf %65, %66 : vector<80x128xbf16>
    %c208 = arith.constant 208 : index
    %c0_22 = arith.constant 0 : index
    %68 = vector.load %arg2[%c208, %c0_22] : memref<704x128xbf16, #tpu.memory_space<vmem>>, vector<128x128xbf16>
    %cst_23 = arith.constant dense<0.000000e+00> : vector<80x128xf32>
    %69 = tpu.matmul %67, %68, %cst_23 {dimension_numbers = #tpu.dot_dimension_numbers<[1], [0], [0], [1], [0, 0, 1, 1], [], []>} : vector<80x128xbf16>, vector<128x128xbf16>, vector<80x128xf32> -> vector<80x128xf32>
    %70 = arith.truncf %69 : vector<80x128xf32> to vector<80x128xbf16>
    %c3 = arith.constant 3 : index
    %c0_24 = arith.constant 0 : index
    %71 = vector.load %arg3[%c3, %c0_24] : memref<16x128xf32, #tpu.memory_space<vmem>>, vector<1x128xf32>
    %72 = arith.truncf %71 : vector<1x128xf32> to vector<1x128xbf16>
    %73 = vector.broadcast %72 : vector<1x128xbf16> to vector<80x128xbf16>
    %74 = arith.addf %70, %73 : vector<80x128xbf16>
    %75 = vector.extract_strided_slice %74 {offsets = [0, 0], sizes = [80, 32], strides = [1, 1]} : vector<80x128xbf16> to vector<80x32xbf16>
    %76 = arith.extf %75 : vector<80x32xbf16> to vector<80x32xf32>
    %cst_25 = arith.constant 0.000000e+00 : bf16
    %77 = vector.broadcast %cst_25 : bf16 to vector<80x128xbf16>
    %78 = arith.maximumf %74, %77 : vector<80x128xbf16>
    %c336 = arith.constant 336 : index
    %c0_26 = arith.constant 0 : index
    %79 = vector.load %arg2[%c336, %c0_26] : memref<704x128xbf16, #tpu.memory_space<vmem>>, vector<128x1xbf16>
    %cst_27 = arith.constant dense<0.000000e+00> : vector<80x1xf32>
    %80 = tpu.matmul %78, %79, %cst_27 {dimension_numbers = #tpu.dot_dimension_numbers<[1], [0], [0], [1], [0, 0, 1, 1], [], []>} : vector<80x128xbf16>, vector<128x1xbf16>, vector<80x1xf32> -> vector<80x1xf32>
    %c4 = arith.constant 4 : index
    %c0_28 = arith.constant 0 : index
    %81 = vector.load %arg3[%c4, %c0_28] : memref<16x128xf32, #tpu.memory_space<vmem>>, vector<1x1xf32>
    %82 = vector.broadcast %81 : vector<1x1xf32> to vector<80x1xf32>
    %83 = arith.addf %80, %82 : vector<80x1xf32>
    %84 = math.exp %83 : vector<80x1xf32>
    %cst_29 = arith.constant 0.000000e+00 : f32
    %85 = vector.broadcast %cst_29 : f32 to vector<80x1xf32>
    %86 = arith.cmpf one, %83, %85 : vector<80x1xf32>
    %87 = arith.extui %86 : vector<80x1xi1> to vector<80x1xi32>
    %88 = arith.sitofp %87 : vector<80x1xi32> to vector<80x1xf32>
    %89 = arith.mulf %84, %88 : vector<80x1xf32>
    %cst_30 = arith.constant dense<0.000000e+00> : vector<16x1xf32>
    %90 = tpu.matmul %23, %89, %cst_30 {dimension_numbers = #tpu.dot_dimension_numbers<[1], [0], [0], [1], [0, 0, 1, 1], [], []>} : vector<16x80xf32>, vector<80x1xf32>, vector<16x1xf32> -> vector<16x1xf32>
    %91 = vector.broadcast %89 : vector<80x1xf32> to vector<80x32xf32>
    %92 = arith.mulf %91, %76 : vector<80x32xf32>
    %cst_31 = arith.constant dense<0.000000e+00> : vector<16x32xf32>
    %93 = tpu.matmul %23, %92, %cst_31 {dimension_numbers = #tpu.dot_dimension_numbers<[1], [0], [0], [1], [0, 0, 1, 1], [], []>} : vector<16x80xf32>, vector<80x32xf32>, vector<16x32xf32> -> vector<16x32xf32>
    %94 = tpu.reciprocal %90 {approx = true} : vector<16x1xf32> -> vector<16x1xf32>
    %95 = vector.broadcast %94 : vector<16x1xf32> to vector<16x32xf32>
    %96 = arith.mulf %93, %95 : vector<16x32xf32>
    %cst_32 = arith.constant dense<0.000000e+00> : vector<16x13xf32>
    %97 = tpu.matmul %30, %0, %cst_32 {dimension_numbers = #tpu.dot_dimension_numbers<[1], [0], [0], [1], [0, 0, 1, 1], [], []>} : vector<16x80xbf16>, vector<80x13xbf16>, vector<16x13xf32> -> vector<16x13xf32>
    %98 = arith.truncf %97 : vector<16x13xf32> to vector<16x13xbf16>
    %c464 = arith.constant 464 : index
    %c0_33 = arith.constant 0 : index
    %99 = vector.load %arg2[%c464, %c0_33] : memref<704x128xbf16, #tpu.memory_space<vmem>>, vector<13x64xbf16>
    %cst_34 = arith.constant dense<0.000000e+00> : vector<16x64xf32>
    %100 = tpu.matmul %98, %99, %cst_34 {dimension_numbers = #tpu.dot_dimension_numbers<[1], [0], [0], [1], [0, 0, 1, 1], [], []>} : vector<16x13xbf16>, vector<13x64xbf16>, vector<16x64xf32> -> vector<16x64xf32>
    %101 = arith.truncf %100 : vector<16x64xf32> to vector<16x64xbf16>
    %102 = arith.truncf %96 : vector<16x32xf32> to vector<16x32xbf16>
    %c480 = arith.constant 480 : index
    %c0_35 = arith.constant 0 : index
    %103 = vector.load %arg2[%c480, %c0_35] : memref<704x128xbf16, #tpu.memory_space<vmem>>, vector<32x64xbf16>
    %cst_36 = arith.constant dense<0.000000e+00> : vector<16x64xf32>
    %104 = tpu.matmul %102, %103, %cst_36 {dimension_numbers = #tpu.dot_dimension_numbers<[1], [0], [0], [1], [0, 0, 1, 1], [], []>} : vector<16x32xbf16>, vector<32x64xbf16>, vector<16x64xf32> -> vector<16x64xf32>
    %105 = arith.truncf %104 : vector<16x64xf32> to vector<16x64xbf16>
    %106 = arith.addf %101, %105 : vector<16x64xbf16>
    %c5 = arith.constant 5 : index
    %c0_37 = arith.constant 0 : index
    %107 = vector.load %arg3[%c5, %c0_37] : memref<16x128xf32, #tpu.memory_space<vmem>>, vector<1x64xf32>
    %108 = arith.truncf %107 : vector<1x64xf32> to vector<1x64xbf16>
    %109 = vector.broadcast %108 : vector<1x64xbf16> to vector<16x64xbf16>
    %110 = arith.addf %106, %109 : vector<16x64xbf16>
    %cst_38 = arith.constant 0.000000e+00 : bf16
    %111 = vector.broadcast %cst_38 : bf16 to vector<16x64xbf16>
    %112 = arith.maximumf %110, %111 : vector<16x64xbf16>
    %c512 = arith.constant 512 : index
    %c0_39 = arith.constant 0 : index
    %113 = vector.load %arg2[%c512, %c0_39] : memref<704x128xbf16, #tpu.memory_space<vmem>>, vector<64x64xbf16>
    %cst_40 = arith.constant dense<0.000000e+00> : vector<16x64xf32>
    %114 = tpu.matmul %112, %113, %cst_40 {dimension_numbers = #tpu.dot_dimension_numbers<[1], [0], [0], [1], [0, 0, 1, 1], [], []>} : vector<16x64xbf16>, vector<64x64xbf16>, vector<16x64xf32> -> vector<16x64xf32>
    %115 = arith.truncf %114 : vector<16x64xf32> to vector<16x64xbf16>
    %c6 = arith.constant 6 : index
    %c0_41 = arith.constant 0 : index
    %116 = vector.load %arg3[%c6, %c0_41] : memref<16x128xf32, #tpu.memory_space<vmem>>, vector<1x64xf32>
    %117 = arith.truncf %116 : vector<1x64xf32> to vector<1x64xbf16>
    %118 = vector.broadcast %117 : vector<1x64xbf16> to vector<16x64xbf16>
    %119 = arith.addf %115, %118 : vector<16x64xbf16>
    %cst_42 = arith.constant 0.000000e+00 : bf16
    %120 = vector.broadcast %cst_42 : bf16 to vector<16x64xbf16>
    %121 = arith.maximumf %119, %120 : vector<16x64xbf16>
    %c576 = arith.constant 576 : index
    %c0_43 = arith.constant 0 : index
    %122 = vector.load %arg2[%c576, %c0_43] : memref<704x128xbf16, #tpu.memory_space<vmem>>, vector<64x64xbf16>
    %cst_44 = arith.constant dense<0.000000e+00> : vector<16x64xf32>
    %123 = tpu.matmul %121, %122, %cst_44 {dimension_numbers = #tpu.dot_dimension_numbers<[1], [0], [0], [1], [0, 0, 1, 1], [], []>} : vector<16x64xbf16>, vector<64x64xbf16>, vector<16x64xf32> -> vector<16x64xf32>
    %124 = arith.truncf %123 : vector<16x64xf32> to vector<16x64xbf16>
    %c7 = arith.constant 7 : index
    %c0_45 = arith.constant 0 : index
    %125 = vector.load %arg3[%c7, %c0_45] : memref<16x128xf32, #tpu.memory_space<vmem>>, vector<1x64xf32>
    %126 = arith.truncf %125 : vector<1x64xf32> to vector<1x64xbf16>
    %127 = vector.broadcast %126 : vector<1x64xbf16> to vector<16x64xbf16>
    %128 = arith.addf %124, %127 : vector<16x64xbf16>
    %cst_46 = arith.constant 0.000000e+00 : bf16
    %129 = vector.broadcast %cst_46 : bf16 to vector<16x64xbf16>
    %130 = arith.maximumf %128, %129 : vector<16x64xbf16>
    %c640 = arith.constant 640 : index
    %c0_47 = arith.constant 0 : index
    %131 = vector.load %arg2[%c640, %c0_47] : memref<704x128xbf16, #tpu.memory_space<vmem>>, vector<64x128xbf16>
    %cst_48 = arith.constant dense<0.000000e+00> : vector<16x128xf32>
    %132 = tpu.matmul %130, %131, %cst_48 {dimension_numbers = #tpu.dot_dimension_numbers<[1], [0], [0], [1], [0, 0, 1, 1], [], []>} : vector<16x64xbf16>, vector<64x128xbf16>, vector<16x128xf32> -> vector<16x128xf32>
    %c8 = arith.constant 8 : index
    %c0_49 = arith.constant 0 : index
    %133 = vector.load %arg3[%c8, %c0_49] : memref<16x128xf32, #tpu.memory_space<vmem>>, vector<1x128xf32>
    %134 = vector.broadcast %133 : vector<1x128xf32> to vector<16x128xf32>
    %135 = arith.addf %132, %134 : vector<16x128xf32>
    %136 = tpu.iota {dimensions = array<i32: 1>} : vector<16x128xi32>
    %c13_i32 = arith.constant 13 : i32
    %137 = vector.broadcast %c13_i32 : i32 to vector<16x128xi32>
    %138 = arith.cmpi slt, %136, %137 : vector<16x128xi32>
    %cst_50 = arith.constant 0xFF800000 : f32
    %139 = vector.broadcast %cst_50 : f32 to vector<16x128xf32>
    %140 = arith.select %138, %135, %139 : vector<16x128xi1>, vector<16x128xf32>
    %cst_51 = arith.constant dense<0xFF800000> : vector<16xf32>
    %141 = vector.multi_reduction <maximumf>, %140, %cst_51 [1] : vector<16x128xf32> to vector<16xf32>
    %142 = vector.shape_cast %141 : vector<16xf32> to vector<16x1xf32>
    %143 = vector.broadcast %142 : vector<16x1xf32> to vector<16x128xf32>
    %144 = arith.subf %140, %143 : vector<16x128xf32>
    %145 = math.exp %144 : vector<16x128xf32>
    %cst_52 = arith.constant dense<0.000000e+00> : vector<16xf32>
    %146 = vector.multi_reduction <add>, %145, %cst_52 [1] : vector<16x128xf32> to vector<16xf32>
    %147 = vector.shape_cast %146 : vector<16xf32> to vector<16x1xf32>
    %148 = tpu.reciprocal %147 {approx = true} : vector<16x1xf32> -> vector<16x1xf32>
    %149 = vector.broadcast %148 : vector<16x1xf32> to vector<16x128xf32>
    %150 = arith.mulf %145, %149 : vector<16x128xf32>
    %c13_i32_53 = arith.constant 13 : i32
    %151 = vector.broadcast %c13_i32_53 : i32 to vector<16x128xi32>
    %152 = arith.cmpi eq, %136, %151 : vector<16x128xi32>
    %cst_54 = arith.constant 0.000000e+00 : f32
    %153 = vector.broadcast %cst_54 : f32 to vector<16x128xf32>
    %154 = arith.select %152, %135, %153 : vector<16x128xi1>, vector<16x128xf32>
    %155 = arith.select %138, %150, %154 : vector<16x128xi1>, vector<16x128xf32>
    %c0_55 = arith.constant 0 : index
    %c0_56 = arith.constant 0 : index
    %156 = vector.load %arg4[%c0_55, %c0_56] : memref<16x128xf32, #tpu.memory_space<vmem>>, vector<16x128xf32>
    tpu.vector_store %arg4[%c0_55, %c0_56], %155 {strides = array<i32>} : memref<16x128xf32, #tpu.memory_space<vmem>>, vector<16x128xf32>,
    return
  }
  func.func @transform_0(%arg0: i32) -> (i32, i32) {
    %c0_i32 = arith.constant 0 : i32
    %c0_i32_0 = arith.constant 0 : i32
    return %arg0, %c0_i32 : i32, i32
  }
  func.func @transform_1(%arg0: i32) -> (i32, i32) {
    %c0_i32 = arith.constant 0 : i32
    %c0_i32_0 = arith.constant 0 : i32
    %c0_i32_1 = arith.constant 0 : i32
    return %c0_i32, %c0_i32_0 : i32, i32
  }
  func.func @transform_2(%arg0: i32) -> (i32, i32) {
    %c0_i32 = arith.constant 0 : i32
    %c0_i32_0 = arith.constant 0 : i32
    %c0_i32_1 = arith.constant 0 : i32
    return %c0_i32, %c0_i32_0 : i32, i32
  }
  func.func @transform_3(%arg0: i32) -> (i32, i32) {
    %c0_i32 = arith.constant 0 : i32
    %c0_i32_0 = arith.constant 0 : i32
    return %arg0, %c0_i32 : i32, i32
  }
}

</mosaic_0001>

<bundles_post_ra>
// kernel: tpu_custom_call.1
= control target key start
LH: loop header
LB: loop body
LE: loop exit
PB: predicated region body
PF: predicated region fallthrough
CT: control target
= control target key end

     0   :  { %8 = vsyncpa [#allocation3], 0  ;;  %s3107_s0 = inlined_call_operand.vmem [shape: bf16[80,13], index: 0, kind: input, shape index: {}]   ;;  %s3108_s1 = inlined_call_operand.hbm [shape: bf16[704,128], index: 1, kind: input, shape index: {}]   ;;  %s3109_s2 = inlined_call_operand.vmem [shape: f32[16,128], index: 2, kind: input, shape index: {}]   ;;  %s3110_s3 = inlined_call_operand.hbm [shape: f32[16,128], index: 3, kind: output, shape index: {}]  }
   0x1   :  { %9 = vsyncpa [#allocation4], 0  ;;  %s2600_s12 = smov [#allocation2]   ;;  %s2552_s16 = scalar_lea.hbm %s3108_s1, 5632 }
   0x2   :  { %s17_s13 = sshll.u32 %s2600_s12, 4  ;;  %p2553_p0 = scmp.ne.s32.totalorder %s3108_s1, %s2552_s16  ;;  %s18_s13 = int_to_ptr.vmem [resolvable:$true] %s17_s13 }
   0x3   :  { %p2556_p1 = scmp.lt.u32.totalorder %s2552_s16, %s3108_s1 }
   0x5   :  { %p2558_p2 = pnand %p2556_p1, %p2553_p0 }
   0x7   :  { %2561 = shalt.err (!%p2558_p2)
}
   0x8   :  { %s2562_s21 = scalar_lea.vmem %s18_s13, 5632  ;;  %p2567_p4 = scmp.lt.s32.totalorder %s18_s13, %s18_s13 }
   0x9   :  { %p2563_p3 = scmp.ne.s32.totalorder %s18_s13, %s2562_s21  ;;  %p2568_p5 = scmp.lt.s32.totalorder %s2562_s21, %s2562_s21 }
   0xb   :  { %p2569_p6 = por %p2568_p5, %p2567_p4 }
   0xd   :  { %p2570_p7 = pnand %p2569_p6, %p2563_p3 }
   0xf   :  { %2573 = shalt.err (!%p2570_p7)
}
  0x10   :  { %s2601_s22 = smov 64   ;;  %s2602_s23 = smov 4  }
  0x11   :  { %23 = dma.hbm_to_vmem [thread:$0]  %s3108_s1, 5632, %s18_s13, [#allocation3], %s2601_s22, %s2601_s22, %s2602_s23  }
  0x12   :  { %2596 = dma.done.wait [#allocation3], 5632  }
  0x13   :  { %2597 = vsyncadd [#allocation3], 4294961664  ;;  %vm180_vm0 = vcmask 1045504   ;;  %v2603_v0 = vmov 0.0   ;;  %vm2604_vm1 = vmmov 0   ;;  %vm181_vm2 = vcmask 1046528  }
  0x14   :  { %2106 = vmatprep.subr.bf16.mxu0 %v2603_v0  ;;  %2128 = vmatprep.subr.bf16.mxu1 %v2603_v0  ;;  %v2605_v1 = vmov 65535   ;;  %v2466_v4 = vld [vmem:[#allocation2] sm:$0x7f]   ;;  %v2468_v6 = vld [vmem:[%s3107_s0] sm:$0xff]   ;;  %vm164_vm3 = vcmask 105472   ;;  %v2474_v8 = vld [vmem:[#allocation2 + $0x10] sm:$0xff]   ;;  %v40_v16 = vlaneseq }
  0x15   :  { %2108 = vmatprep.mubr.msk.bf16.mxu0 %vm2604_vm1, %v2603_v0  ;;  %2136 = vmatprep.mubr.msk.bf16.mxu1 %vm2604_vm1, %v2603_v0  ;;  %v182_v2 = vsel %vm180_vm0, 4294967295, %v2605_v1  ;;  %v2473_v7 = vld [vmem:[#allocation2 + $0x8] sm:$0xff]   ;;  %v2469_v9 = vld [vmem:[%s3107_s0 + $0x8] sm:$0xff]   ;;  %v2470_v10 = vld [vmem:[%s3107_s0 + $0x10] sm:$0xff]   ;;  %v2606_v15 = vmov 0   ;;  %vm316_vm4 = vcmask 523264  }
  0x16   :  { %v2648_v3 = vsel %vm181_vm2, %v182_v2, 0  ;;  %2129 = vmatpush3.bf16.msra.mxu1 %v2473_v7  ;;  %v2471_v11 = vld [vmem:[%s3107_s0 + $0x18] sm:$0xff]   ;;  %v2472_v12 = vld [vmem:[%s3107_s0 + $0x20] sm:$0xff]   ;;  %v2475_v13 = vld [vmem:[#allocation2 + $0x18] sm:$0xff]   ;;  %2464 = vset.pattern.permute.xlu0 %v2606_v15  ;;  %v2692_v18 = vshrl.u32 %v40_v16, 7  ;;  %vm429_vm11 = vcmask 654336  }
  0x17   :  { %v185_v5 = vand.u32 %v2466_v4, %v2648_v3  ;;  %2130 = vmatprep.subr.bf16.mxu1 %v2603_v0  ;;  %v2476_v14 = vld [vmem:[#allocation2 + $0x20] sm:$0xff]   ;;  %2465 = vset.pattern.permute.xlu1 %v2606_v15  ;;  %v265_v17 = vld [vmem:[%s3109_s2] sm:$0x1]  ;;  %v2482_v59 = vld [vmem:[#allocation2 + $0x50] sm:$0xff]  }
  0x18   :  { %v266_v19 = vpack.c.bf16 %v265_v17, %v265_v17  ;;  %v2695_v21 = vsub.s32 0, %v2692_v18  ;;  %v2481_v58 = vld [vmem:[#allocation2 + $0x48] sm:$0xff]   ;;  %v2483_v60 = vld [vmem:[#allocation2 + $0x58] sm:$0xff]  }
  0x19   :  { %2107 = vmatpush3.bf16.msra.mxu0 %v185_v5  ;;  %v410_v61 = vld [vmem:[%s3109_s2 + $0x1] sm:$0x1] }
  0x1a   :  { %2156 = vmatprep.subr.bf16.mxu0 %v2603_v0  ;;  %2131 = vmatpush3.bf16.msra.mxu1 %v2474_v8  ;;  %v268_v20 = vpack.i.b16 %v266_v19, %v266_v19  ;;  %v411_v62 = vpack.c.bf16 %v410_v61, %v410_v61 }
  0x1b   :  { %2132 = vmatprep.subr.bf16.mxu1 %v2603_v0 }
  0x1c   :  { %2109 = vmatmul.mubr.msk.bf16.vlgmr.msra.gmra.mrb[0].mxu0 %vm164_vm3, %v2468_v6  ;;  %v273_v24 = vrot.slane %v268_v20, %v2695_v21  ;;  %v413_v63 = vpack.i.b16 %v411_v62, %v411_v62 }
  0x1d   :  { %2112 = vmatprep.mubr.msk.bf16.mxu0 %vm2604_vm1, %v2603_v0 }
  0x1e   :  { %2133 = vmatpush3.bf16.msra.mxu1 %v2475_v13  ;;  %v418_v4 = vrot.slane %v413_v63, %v2695_v21 }
  0x1f   :  { %2134 = vmatprep.subr.bf16.mxu1 %v2603_v0 }
  0x22   :  { %2135 = vmatpush3.bf16.msra.mxu1 %v2476_v14 }
  0x23   :  { %2170 = vmatprep.subr.bf16.mxu1 %v2603_v0 }
  0x24   :  { %2113 = vmatmul.mubr.msk.bf16.gmra.mrb[4].mxu0 %vm164_vm3, %v2469_v9 }
  0x25   :  { %2116 = vmatprep.mubr.msk.bf16.mxu0 %vm2604_vm1, %v2603_v0 }
  0x2c   :  { %2117 = vmatmul.mubr.msk.bf16.gmra.mrb[8].mxu0 %vm164_vm3, %v2470_v10 }
  0x2d   :  { %2120 = vmatprep.mubr.msk.bf16.mxu0 %vm2604_vm1, %v2603_v0 }
  0x34   :  { %2121 = vmatmul.mubr.msk.bf16.gmra.mrb[12].mxu0 %vm164_vm3, %v2471_v11 }
  0x35   :  { %2124 = vmatprep.mubr.msk.bf16.mxu0 %vm2604_vm1, %v2603_v0 }
  0x3c   :  { %2125 = vmatmul.mubr.msk.bf16.gmra.mrb[16].mxu0 %vm164_vm3, %v2472_v12 }
  0x3d   :  { %2166 = vmatprep.mubr.msk.bf16.mxu0 %vm2604_vm1, %v2603_v0 }
  0xef   :  { %v221_v22 = vpop.f32.mrb[0].mxu0 }
  0xf0   :  { %v2110_v23 = vpop.f32.mrb[1].mxu0 }
  0xf1   :  { %v224_v25 = vpop.f32.mrb[2].mxu0 }
  0xf2   :  { %v260_v26 = vpack.c.bf16 %v224_v25, %v221_v22  ;;  %v2111_v27 = vpop.f32.mrb[3].mxu0 }
  0xf4   :  { %v274_v28 = vadd.bf16 %v273_v24, %v260_v26  ;;  %v2733_v26 = vadd.s32 8, %v2692_v18 }
  0xf6   :  { %v279_v29 = vmax.bf16 %v2606_v15, %v274_v28  ;;  %v2736_v28 = vmul.u32 5, %v2692_v18 }
  0xf7   :  { %v229_v30 = vpop.f32.mrb[4].mxu0 }
  0xf8   :  { %v2114_v31 = vpop.f32.mrb[5].mxu0  ;;  %2137 = vmatmul.mubr.msk.bf16.vlgmr.msra.gmra.mrb[0].mxu1 %vm316_vm4, %v279_v29 }
  0xf9   :  { %v232_v32 = vpop.f32.mrb[6].mxu0  ;;  %2140 = vmatprep.mubr.msk.bf16.mxu1 %vm2604_vm1, %v2603_v0  ;;  %2171 = vmatpush3.bf16.msra.mxu1 %v2481_v58 }
  0xfa   :  { %v261_v33 = vpack.c.bf16 %v232_v32, %v229_v30  ;;  %v2115_v34 = vpop.f32.mrb[7].mxu0  ;;  %2172 = vmatprep.subr.bf16.mxu1 %v2603_v0  ;;  %v2740_v30 = vmul.u32 5, %v2733_v26 }
  0xfb   :  { %v2744_v34 = vand.u32 127, %v40_v16 }
  0xfc   :  { %v275_v35 = vadd.bf16 %v273_v24, %v261_v33 }
  0xfd   :  { %2173 = vmatpush3.bf16.msra.mxu1 %v2482_v59  ;;  %vm112_vm5 = vcmp.ge.s32.totalorder %v2744_v34, %v2736_v28  ;;  %vm113_vm7 = vcmp.ge.s32.totalorder %v2744_v34, %v2740_v30 }
  0xfe   :  { %v280_v36 = vmax.bf16 %v2606_v15, %v275_v35  ;;  %2174 = vmatprep.subr.bf16.mxu1 %v2603_v0  ;;  %v114_v35 = vadd.s32 5, %v2736_v28 }
  0xff   :  { %v237_v37 = vpop.f32.mrb[8].mxu0 }
 0x100   :  { %v2118_v38 = vpop.f32.mrb[9].mxu0  ;;  %2141 = vmatmul.mubr.msk.bf16.gmra.mrb[4].mxu1 %vm316_vm4, %v280_v36  ;;  %vm116_vm6 = vcmp.lt.s32.totalorder %v2744_v34, %v114_v35  ;;  %v2487_v35 = vld [vmem:[#allocation2 + $0x78] sm:$0xff]  }
 0x101   :  { %v240_v39 = vpop.f32.mrb[10].mxu0  ;;  %2144 = vmatprep.mubr.msk.bf16.mxu1 %vm2604_vm1, %v2603_v0  ;;  %2175 = vmatpush3.bf16.msra.mxu1 %v2483_v60  ;;  %v115_v38 = vadd.s32 5, %v2740_v30  ;;  %vm118_vm9 = vmand %vm112_vm5, %vm116_vm6 }
 0x102   :  { %v262_v40 = vpack.c.bf16 %v240_v39, %v237_v37  ;;  %v2119_v41 = vpop.f32.mrb[11].mxu0  ;;  %2176 = vmatprep.subr.bf16.mxu1 %v2603_v0 }
 0x103   :  { %vm117_vm8 = vcmp.lt.s32.totalorder %v2744_v34, %v115_v38  ;;  %v2829_v38 = vmul.u32 5, %v2744_v34 }
 0x104   :  { %v276_v42 = vadd.bf16 %v273_v24, %v262_v40  ;;  %vm119_vm10 = vmand %vm113_vm7, %vm117_vm8 }
 0x105   :  { %vm54_vm12 = vcmp.ge.s32.totalorder %v2692_v18, %v2829_v38  ;;  %vm55_vm14 = vcmp.ge.s32.totalorder %v2733_v26, %v2829_v38 }
 0x106   :  { %v281_v43 = vmax.bf16 %v2606_v15, %v276_v42 }
 0x107   :  { %v245_v44 = vpop.f32.mrb[12].mxu0 }
 0x108   :  { %v2122_v45 = vpop.f32.mrb[13].mxu0  ;;  %2145 = vmatmul.mubr.msk.bf16.gmra.mrb[8].mxu1 %vm316_vm4, %v281_v43 }
 0x109   :  { %v248_v46 = vpop.f32.mrb[14].mxu0  ;;  %2148 = vmatprep.mubr.msk.bf16.mxu1 %vm2604_vm1, %v2603_v0 }
 0x10a   :  { %v263_v47 = vpack.c.bf16 %v248_v46, %v245_v44  ;;  %v2123_v48 = vpop.f32.mrb[15].mxu0  ;;  %v2757_v46 = vsel %vm118_vm9, 1.0, %v2603_v0  ;;  %vm679_vm9 = vcmask 130048  }
 0x10c   :  { %v277_v49 = vadd.bf16 %v273_v24, %v263_v47  ;;  %v2760_v47 = vsel %vm119_vm10, 1.0, %v2603_v0 }
 0x10e   :  { %v282_v50 = vmax.bf16 %v2606_v15, %v277_v49  ;;  %v124_v49 = vpack.c.bf16 %v2760_v47, %v2757_v46 }
 0x10f   :  { %v253_v51 = vpop.f32.mrb[16].mxu0 }
 0x110   :  { %v2126_v52 = vpop.f32.mrb[17].mxu0  ;;  %2149 = vmatmul.mubr.msk.bf16.gmra.mrb[12].mxu1 %vm316_vm4, %v282_v50  ;;  %v2477_v50 = vld [vmem:[#allocation2 + $0x28] sm:$0xff]  }
 0x111   :  { %v256_v53 = vpop.f32.mrb[18].mxu0  ;;  %2152 = vmatprep.mubr.msk.bf16.mxu1 %vm2604_vm1, %v2603_v0  ;;  %v2479_v52 = vld [vmem:[#allocation2 + $0x38] sm:$0xff]  }
 0x112   :  { %v264_v54 = vpack.c.bf16 %v256_v53, %v253_v51  ;;  %v2127_v55 = vpop.f32.mrb[19].mxu0  ;;  %v2478_v51 = vld [vmem:[#allocation2 + $0x30] sm:$0xff]   ;;  %v2480_v53 = vld [vmem:[#allocation2 + $0x40] sm:$0xff]  }
 0x114   :  { %v278_v56 = vadd.bf16 %v273_v24, %v264_v54  ;;  %v2484_v54 = vld [vmem:[#allocation2 + $0x60] sm:$0xff]  }
 0x115   :  { %2177 = vmatpush3.bf16.msra.mxu1 %v2484_v54 }
 0x116   :  { %v283_v57 = vmax.bf16 %v2606_v15, %v278_v56  ;;  %2210 = vmatprep.subr.bf16.mxu1 %v2603_v0 }
 0x118   :  { %2153 = vmatmul.mubr.msk.bf16.gmra.mrb[16].mxu1 %vm316_vm4, %v283_v57 }
 0x119   :  { %2178 = vmatprep.mubr.msk.bf16.mxu1 %vm2604_vm1, %v2603_v0 }
 0x1cb   :  { %v366_v1 = vpop.f32.mrb[0].mxu1 }
 0x1cc   :  { %v2138_v2 = vpop.f32.mrb[1].mxu1 }
 0x1cd   :  { %v369_v5 = vpop.f32.mrb[2].mxu1 }
 0x1ce   :  { %v405_v6 = vpack.c.bf16 %v369_v5, %v366_v1  ;;  %v2139_v7 = vpop.f32.mrb[3].mxu1 }
 0x1d0   :  { %v419_v8 = vadd.bf16 %v418_v4, %v405_v6 }
 0x1d2   :  { %v2726_v9 = vmax.bf16 %v2606_v15, %v419_v8 }
 0x1d3   :  { %v374_v10 = vpop.f32.mrb[4].mxu1 }
 0x1d4   :  { %v2142_v11 = vpop.f32.mrb[5].mxu1  ;;  %2157 = vmatpush3.bf16.msra.mxu0 %v2726_v9 }
 0x1d5   :  { %v377_v12 = vpop.f32.mrb[6].mxu1  ;;  %2158 = vmatprep.subr.bf16.mxu0 %v2603_v0 }
 0x1d6   :  { %v406_v13 = vpack.c.bf16 %v377_v12, %v374_v10  ;;  %v2143_v14 = vpop.f32.mrb[7].mxu1 }
 0x1d8   :  { %v420_v17 = vadd.bf16 %v418_v4, %v406_v13 }
 0x1da   :  { %v425_v19 = vmax.bf16 %v2606_v15, %v420_v17 }
 0x1db   :  { %v382_v20 = vpop.f32.mrb[8].mxu1 }
 0x1dc   :  { %v2146_v22 = vpop.f32.mrb[9].mxu1  ;;  %2159 = vmatpush3.bf16.msra.mxu0 %v425_v19 }
 0x1dd   :  { %v385_v23 = vpop.f32.mrb[10].mxu1  ;;  %2160 = vmatprep.subr.bf16.mxu0 %v2603_v0 }
 0x1de   :  { %v407_v24 = vpack.c.bf16 %v385_v23, %v382_v20  ;;  %v2147_v25 = vpop.f32.mrb[11].mxu1 }
 0x1e0   :  { %v421_v27 = vadd.bf16 %v418_v4, %v407_v24 }
 0x1e2   :  { %v426_v29 = vmax.bf16 %v2606_v15, %v421_v27 }
 0x1e3   :  { %v390_v31 = vpop.f32.mrb[12].mxu1 }
 0x1e4   :  { %v2150_v32 = vpop.f32.mrb[13].mxu1  ;;  %2161 = vmatpush3.bf16.msra.mxu0 %v426_v29 }
 0x1e5   :  { %v393_v33 = vpop.f32.mrb[14].mxu1  ;;  %2162 = vmatprep.subr.bf16.mxu0 %v2603_v0  ;;  %v2485_v32 = vld [vmem:[#allocation2 + $0x68] sm:$0xff]  }
 0x1e6   :  { %v408_v36 = vpack.c.bf16 %v393_v33, %v390_v31  ;;  %v2151_v37 = vpop.f32.mrb[15].mxu1  ;;  %v2486_v33 = vld [vmem:[#allocation2 + $0x70] sm:$0xff]  }
 0x1e7   :  { %v2489_v37 = vld [vmem:[#allocation2 + $0x88] sm:$0xff]  }
 0x1e8   :  { %v422_v39 = vadd.bf16 %v418_v4, %v408_v36  ;;  %v2488_v36 = vld [vmem:[#allocation2 + $0x80] sm:$0xff]  }
 0x1ea   :  { %v427_v40 = vmax.bf16 %v2606_v15, %v422_v39  ;;  %v2832_v39 = vadd.s32 5, %v2829_v38 }
 0x1eb   :  { %v398_v16 = vpop.f32.mrb[16].mxu1 }
 0x1ec   :  { %v2154_v41 = vpop.f32.mrb[17].mxu1  ;;  %2163 = vmatpush3.bf16.msra.mxu0 %v427_v40  ;;  %vm65_vm13 = vcmp.lt.s32.totalorder %v2692_v18, %v2832_v39  ;;  %vm66_vm15 = vcmp.lt.s32.totalorder %v2733_v26, %v2832_v39 }
 0x1ed   :  { %v401_v42 = vpop.f32.mrb[18].mxu1  ;;  %2164 = vmatprep.subr.bf16.mxu0 %v2603_v0  ;;  %vm75_vm0 = vmand %vm54_vm12, %vm65_vm13 }
 0x1ee   :  { %v409_v43 = vpack.c.bf16 %v401_v42, %v398_v16  ;;  %v2155_v44 = vpop.f32.mrb[19].mxu1  ;;  %vm76_vm2 = vmand %vm55_vm14, %vm66_vm15  ;;  %v44_v16 = vadd.s32 24, %v2692_v18 }
 0x1ef   :  { %v1883_v44 = vsel %vm76_vm2, 1.0, %v2603_v0 }
 0x1f0   :  { %v423_v45 = vadd.bf16 %v418_v4, %v409_v43  ;;  %v1882_v43 = vsel %vm75_vm0, 1.0, %v2603_v0  ;;  %vm57_vm7 = vcmp.ge.s32.totalorder %v44_v16, %v2829_v38  ;;  %vm68_vm8 = vcmp.lt.s32.totalorder %v44_v16, %v2832_v39 }
 0x1f1   :  { %v105_v26 = vpack.c.bf16 %v1883_v44, %v1882_v43  ;;  %vm78_vm12 = vmand %vm57_vm7, %vm68_vm8 }
 0x1f2   :  { %v428_v48 = vmax.bf16 %v2606_v15, %v423_v45 }
 0x1f4   :  { %2165 = vmatpush3.bf16.msra.mxu0 %v428_v48 }
 0x1f5   :  { %2182 = vmatprep.subr.bf16.mxu0 %v2603_v0 }
 0x1f7   :  { %2167 = vmatmul.mubr.msk.bf16.vlgmr.msra.gmra.mrb[20].mxu0 %vm429_vm11, %v124_v49 }
 0x1f8   :  { %2183 = vmatpush3.bf16.msra.mxu0 %v2477_v50  ;;  %2190 = vmatprep.mubr.msk.bf16.mxu0 %vm2604_vm1, %v2603_v0  ;;  %v45_v50 = vadd.s32 32, %v2692_v18 }
 0x1f9   :  { %2184 = vmatprep.subr.bf16.mxu0 %v2603_v0 }
 0x1fa   :  { %vm58_vm13 = vcmp.ge.s32.totalorder %v45_v50, %v2829_v38  ;;  %vm69_vm14 = vcmp.lt.s32.totalorder %v45_v50, %v2832_v39 }
 0x1fb   :  { %vm79_vm2 = vmand %vm58_vm13, %vm69_vm14 }
 0x1fc   :  { %2185 = vmatpush3.bf16.msra.mxu0 %v2478_v51  ;;  %v46_v51 = vadd.s32 40, %v2692_v18 }
 0x1fd   :  { %2186 = vmatprep.subr.bf16.mxu0 %v2603_v0 }
 0x1fe   :  { %vm59_vm15 = vcmp.ge.s32.totalorder %v46_v51, %v2829_v38  ;;  %vm70_vm0 = vcmp.lt.s32.totalorder %v46_v51, %v2832_v39 }
 0x200   :  { %2187 = vmatpush3.bf16.msra.mxu0 %v2479_v52 }
 0x201   :  { %2188 = vmatprep.subr.bf16.mxu0 %v2603_v0 }
 0x204   :  { %2189 = vmatpush3.bf16.msra.mxu0 %v2480_v53  ;;  %v1885_v53 = vsel %vm78_vm12, 1.0, %v2603_v0 }
 0x205   :  { %2232 = vmatprep.subr.bf16.mxu0 %v2603_v0 }
 0x207   :  { %2191 = vmatmul.mubr.msk.bf16.vlgmr.msra.gmra.mrb[24].mxu0 %vm316_vm4, %v2726_v9 }
 0x208   :  { %2194 = vmatprep.mubr.msk.bf16.mxu0 %vm2604_vm1, %v2603_v0  ;;  %2233 = vmatpush3.bf16.msra.mxu0 %v2485_v32  ;;  %v2495_v32 = vld [vmem:[#allocation2 + $0xb8] sm:$0xff]  }
 0x209   :  { %2234 = vmatprep.subr.bf16.mxu0 %v2603_v0 }
 0x20c   :  { %2235 = vmatpush3.bf16.msra.mxu0 %v2486_v33  ;;  %v2496_v33 = vld [vmem:[#allocation2 + $0xc0] sm:$0xff]  }
 0x20d   :  { %2236 = vmatprep.subr.bf16.mxu0 %v2603_v0 }
 0x20f   :  { %2195 = vmatmul.mubr.msk.bf16.gmra.mrb[28].mxu0 %vm316_vm4, %v425_v19 }
 0x210   :  { %2198 = vmatprep.mubr.msk.bf16.mxu0 %vm2604_vm1, %v2603_v0  ;;  %2237 = vmatpush3.bf16.msra.mxu0 %v2487_v35  ;;  %v2497_v35 = vld [vmem:[#allocation2 + $0xc8] sm:$0xff]  }
 0x211   :  { %2238 = vmatprep.subr.bf16.mxu0 %v2603_v0 }
 0x214   :  { %2239 = vmatpush3.bf16.msra.mxu0 %v2488_v36  ;;  %v2498_v36 = vld [vmem:[#allocation2 + $0xd0] sm:$0xff]  }
 0x215   :  { %2240 = vmatprep.subr.bf16.mxu0 %v2603_v0 }
 0x217   :  { %2199 = vmatmul.mubr.msk.bf16.gmra.mrb[32].mxu0 %vm316_vm4, %v426_v29 }
 0x218   :  { %2202 = vmatprep.mubr.msk.bf16.mxu0 %vm2604_vm1, %v2603_v0  ;;  %2241 = vmatpush3.bf16.msra.mxu0 %v2489_v37  ;;  %v778_v37 = vld [vmem:[%s3109_s2 + $0x2] sm:$0x1] }
 0x219   :  { %2242 = vmatprep.subr.bf16.mxu0 %v2603_v0 }
 0x21f   :  { %2203 = vmatmul.mubr.msk.bf16.gmra.mrb[36].mxu0 %vm316_vm4, %v427_v40  ;;  %v43_v40 = vadd.s32 16, %v2692_v18 }
 0x220   :  { %2206 = vmatprep.mubr.msk.bf16.mxu0 %vm2604_vm1, %v2603_v0 }
 0x221   :  { %vm56_vm5 = vcmp.ge.s32.totalorder %v43_v40, %v2829_v38  ;;  %vm67_vm6 = vcmp.lt.s32.totalorder %v43_v40, %v2832_v39 }
 0x222   :  { %vm77_vm10 = vmand %vm56_vm5, %vm67_vm6 }
 0x223   :  { %v1884_v52 = vsel %vm77_vm10, 1.0, %v2603_v0  ;;  %vm80_vm5 = vmand %vm59_vm15, %vm70_vm0 }
 0x224   :  { %v106_v54 = vpack.c.bf16 %v1885_v53, %v1884_v52 }
 0x227   :  { %2207 = vmatmul.mubr.msk.bf16.gmra.mrb[40].mxu0 %vm316_vm4, %v428_v48 }
 0x228   :  { %2248 = vmatprep.mubr.msk.bf16.mxu0 %vm2604_vm1, %v2603_v0 }
 0x2ca   :  { %v467_v55 = vpop.f32.mrb[20].mxu0 }
 0x2cb   :  { %v2168_v56 = vpop.f32.mrb[21].mxu0  ;;  %v474_v58 = vmul.f32 0.2, %v467_v55  ;;  %v47_v55 = vadd.s32 48, %v2692_v18 }
 0x2cc   :  { %v470_v57 = vpop.f32.mrb[22].mxu0  ;;  %v48_v56 = vadd.s32 56, %v2692_v18 }
 0x2cd   :  { %v475_v59 = vmul.f32 0.2, %v470_v57  ;;  %v2169_v60 = vpop.f32.mrb[23].mxu0  ;;  %v1886_v57 = vsel %vm79_vm2, 1.0, %v2603_v0  ;;  %vm60_vm6 = vcmp.ge.s32.totalorder %v47_v55, %v2829_v38  ;;  %vm71_vm7 = vcmp.lt.s32.totalorder %v47_v55, %v2832_v39 }
 0x2ce   :  { %vm61_vm8 = vcmp.ge.s32.totalorder %v48_v56, %v2829_v38  ;;  %vm72_vm10 = vcmp.lt.s32.totalorder %v48_v56, %v2832_v39  ;;  %vm81_vm12 = vmand %vm60_vm6, %vm71_vm7  ;;  %v49_v60 = vadd.s32 64, %v2692_v18 }
 0x2cf   :  { %v476_v61 = vpack.c.bf16 %v475_v59, %v474_v58  ;;  %v1887_v58 = vsel %vm80_vm5, 1.0, %v2603_v0  ;;  %vm82_vm13 = vmand %vm61_vm8, %vm72_vm10 }
 0x2d0   :  { %v107_v59 = vpack.c.bf16 %v1887_v58, %v1886_v57  ;;  %vm62_vm14 = vcmp.ge.s32.totalorder %v49_v60, %v2829_v38  ;;  %vm73_vm15 = vcmp.lt.s32.totalorder %v49_v60, %v2832_v39 }
 0x2d1   :  { %2179 = vmatmul.mubr.msk.bf16.vlgmr.msra.gmra.mrb[20].mxu1 %vm316_vm4, %v476_v61  ;;  %v50_v61 = vadd.s32 72, %v2692_v18  ;;  %vm83_vm5 = vmand %vm62_vm14, %vm73_vm15 }
 0x2d2   :  { %2212 = vmatprep.mubr.msk.bf16.mxu1 %vm2604_vm1, %v2603_v0  ;;  %v1890_v18 = vsel %vm83_vm5, 1.0, %v2603_v0  ;;  %vm125_vm5 = vcmp.eq.s32.totalorder %v2744_v34, %v2736_v28  ;;  %v2551_v28 = vld [vmem:[%s3107_s0 + $0x20] sm:$0xff]  }
 0x2d3   :  { %vm63_vm0 = vcmp.ge.s32.totalorder %v50_v61, %v2829_v38  ;;  %vm74_vm2 = vcmp.lt.s32.totalorder %v50_v61, %v2832_v39  ;;  %v779_v38 = vpack.c.bf16 %v778_v37, %v778_v37 }
 0x2d4   :  { %vm84_vm6 = vmand %vm63_vm0, %vm74_vm2 }
 0x2d5   :  { %v781_v39 = vpack.i.b16 %v779_v38, %v779_v38 }
 0x2d7   :  { %v786_v43 = vrot.slane %v781_v39, %v2695_v21 }
 0x2da   :  { %v2793_v62 = vpop.f32.mrb[24].mxu0 }
 0x2db   :  { %v2192_v63 = vpop.f32.mrb[25].mxu0 }
 0x2dc   :  { %v2795_v1 = vpop.f32.mrb[26].mxu0  ;;  %v1888_v63 = vsel %vm81_vm12, 1.0, %v2603_v0 }
 0x2dd   :  { %v673_v2 = vpack.c.bf16 %v2795_v1, %v2793_v62  ;;  %v2193_v4 = vpop.f32.mrb[27].mxu0 }
 0x2de   :  { %v1889_v4 = vsel %vm82_vm13, 1.0, %v2603_v0 }
 0x2e2   :  { %v2799_v5 = vpop.f32.mrb[28].mxu0 }
 0x2e3   :  { %v2196_v6 = vpop.f32.mrb[29].mxu0 }
 0x2e4   :  { %v2801_v7 = vpop.f32.mrb[30].mxu0  ;;  %v108_v6 = vpack.c.bf16 %v1889_v4, %v1888_v63 }
 0x2e5   :  { %v674_v8 = vpack.c.bf16 %v2801_v7, %v2799_v5  ;;  %v2197_v9 = vpop.f32.mrb[31].mxu0 }
 0x2e6   :  { %v1891_v9 = vsel %vm84_vm6, 1.0, %v2603_v0  ;;  %vm126_vm6 = vcmp.eq.s32.totalorder %v2744_v34, %v2740_v30 }
 0x2ea   :  { %v2805_v10 = vpop.f32.mrb[32].mxu0 }
 0x2eb   :  { %v2200_v11 = vpop.f32.mrb[33].mxu0 }
 0x2ec   :  { %v2807_v12 = vpop.f32.mrb[34].mxu0  ;;  %v109_v11 = vpack.c.bf16 %v1891_v9, %v1890_v18 }
 0x2ed   :  { %v675_v13 = vpack.c.bf16 %v2807_v12, %v2805_v10  ;;  %v2201_v14 = vpop.f32.mrb[35].mxu0 }
 0x2ee   :  { %v2490_v14 = vld [vmem:[#allocation2 + $0x90] sm:$0xff]  }
 0x2ef   :  { %2243 = vmatpush3.bf16.msra.mxu0 %v2490_v14 }
 0x2f0   :  { %2244 = vmatprep.subr.bf16.mxu0 %v2603_v0 }
 0x2f2   :  { %v2811_v17 = vpop.f32.mrb[36].mxu0 }
 0x2f3   :  { %v2204_v19 = vpop.f32.mrb[37].mxu0 }
 0x2f4   :  { %v2813_v20 = vpop.f32.mrb[38].mxu0  ;;  %v2491_v19 = vld [vmem:[#allocation2 + $0x98] sm:$0xff]  }
 0x2f5   :  { %v676_v22 = vpack.c.bf16 %v2813_v20, %v2811_v17  ;;  %v2205_v23 = vpop.f32.mrb[39].mxu0  ;;  %2245 = vmatpush3.bf16.msra.mxu0 %v2491_v19  ;;  %v2499_v20 = vld [vmem:[#allocation2 + $0xd8] sm:$0xff]  }
 0x2f6   :  { %2246 = vmatprep.subr.bf16.mxu0 %v2603_v0  ;;  %v2492_v23 = vld [vmem:[#allocation2 + $0xa0] sm:$0xff]  }
 0x2f9   :  { %2247 = vmatpush3.bf16.msra.mxu0 %v2492_v23 }
 0x2fa   :  { %v2817_v24 = vpop.f32.mrb[40].mxu0 }
 0x2fb   :  { %v2208_v25 = vpop.f32.mrb[41].mxu0 }
 0x2fc   :  { %v2819_v27 = vpop.f32.mrb[42].mxu0  ;;  %v2493_v25 = vld [vmem:[#allocation2 + $0xa8] sm:$0xff]  }
 0x2fd   :  { %v677_v29 = vpack.c.bf16 %v2819_v27, %v2817_v24  ;;  %v2209_v31 = vpop.f32.mrb[43].mxu0 }
 0x2fe   :  { %v2494_v31 = vld [vmem:[#allocation2 + $0xb0] sm:$0xff]  }
 0x3a4   :  { %v546_v41 = vpop.f32.mrb[20].mxu1 }
 0x3a5   :  { %v2180_v42 = vpop.f32.mrb[21].mxu1 }
 0x3a6   :  { %v549_v45 = vpop.f32.mrb[22].mxu1 }
 0x3a7   :  { %v678_v48 = vpack.c.bf16 %v549_v45, %v546_v41  ;;  %v2181_v49 = vpop.f32.mrb[23].mxu1 }
 0x3a9   :  { %2211 = vmatpush3.bf16.msra.mxu1 %v678_v48 }
 0x3aa   :  { %2268 = vmatprep.subr.bf16.mxu1 %v2603_v0 }
 0x3ac   :  { %2213 = vmatmul.mubr.msk.bf16.vlgmr.msra.gmra.mrb[24].mxu1 %vm679_vm9, %v105_v26 }
 0x3ad   :  { %2216 = vmatprep.mubr.msk.bf16.mxu1 %vm2604_vm1, %v2603_v0  ;;  %2269 = vmatpush3.bf16.msra.mxu1 %v2493_v25  ;;  %v939_v25 = vld [vmem:[%s3109_s2 + $0x3] sm:$0x1] }
 0x3ae   :  { %2270 = vmatprep.subr.bf16.mxu1 %v2603_v0 }
 0x3b1   :  { %2271 = vmatpush3.bf16.msra.mxu1 %v2494_v31  ;;  %v940_v31 = vpack.c.bf16 %v939_v25, %v939_v25 }
 0x3b2   :  { %2272 = vmatprep.subr.bf16.mxu1 %v2603_v0 }
 0x3b3   :  { %v942_v24 = vpack.i.b16 %v940_v31, %v940_v31 }
 0x3b4   :  { %2217 = vmatmul.mubr.msk.bf16.gmra.mrb[28].mxu1 %vm679_vm9, %v106_v54 }
 0x3b5   :  { %2220 = vmatprep.mubr.msk.bf16.mxu1 %vm2604_vm1, %v2603_v0  ;;  %2273 = vmatpush3.bf16.msra.mxu1 %v2495_v32  ;;  %v947_v32 = vrot.slane %v942_v24, %v2695_v21 }
 0x3b6   :  { %2274 = vmatprep.subr.bf16.mxu1 %v2603_v0 }
 0x3b9   :  { %2275 = vmatpush3.bf16.msra.mxu1 %v2496_v33 }
 0x3ba   :  { %2276 = vmatprep.subr.bf16.mxu1 %v2603_v0 }
 0x3bc   :  { %2221 = vmatmul.mubr.msk.bf16.gmra.mrb[32].mxu1 %vm679_vm9, %v107_v59 }
 0x3bd   :  { %2224 = vmatprep.mubr.msk.bf16.mxu1 %vm2604_vm1, %v2603_v0  ;;  %2277 = vmatpush3.bf16.msra.mxu1 %v2497_v35 }
 0x3be   :  { %2278 = vmatprep.subr.bf16.mxu1 %v2603_v0 }
 0x3c1   :  { %2279 = vmatpush3.bf16.msra.mxu1 %v2498_v36 }
 0x3c2   :  { %2280 = vmatprep.subr.bf16.mxu1 %v2603_v0 }
 0x3c4   :  { %2225 = vmatmul.mubr.msk.bf16.gmra.mrb[36].mxu1 %vm679_vm9, %v108_v6 }
 0x3c5   :  { %2228 = vmatprep.mubr.msk.bf16.mxu1 %vm2604_vm1, %v2603_v0  ;;  %2281 = vmatpush3.bf16.msra.mxu1 %v2499_v20 }
 0x3c6   :  { %2282 = vmatprep.subr.bf16.mxu1 %v2603_v0 }
 0x3cc   :  { %2229 = vmatmul.mubr.msk.bf16.gmra.mrb[40].mxu1 %vm679_vm9, %v109_v11 }
 0x3cd   :  { %2284 = vmatprep.mubr.msk.bf16.mxu1 %vm2604_vm1, %v2603_v0 }
 0x47f   :  { %v729_v40 = vpop.f32.mrb[24].mxu1 }
 0x480   :  { %v2214_v16 = vpop.f32.mrb[25].mxu1 }
 0x481   :  { %v732_v41 = vpop.f32.mrb[26].mxu1 }
 0x482   :  { %v768_v42 = vpack.c.bf16 %v732_v41, %v729_v40  ;;  %v2215_v44 = vpop.f32.mrb[27].mxu1 }
 0x484   :  { %v773_v45 = vadd.bf16 %v768_v42, %v673_v2 }
 0x486   :  { %v787_v48 = vadd.bf16 %v786_v43, %v773_v45 }
 0x487   :  { %v737_v49 = vpop.f32.mrb[28].mxu1 }
 0x488   :  { %v792_v26 = vmax.bf16 %v2606_v15, %v787_v48  ;;  %v2218_v50 = vpop.f32.mrb[29].mxu1 }
 0x489   :  { %v740_v51 = vpop.f32.mrb[30].mxu1 }
 0x48a   :  { %v769_v52 = vpack.c.bf16 %v740_v51, %v737_v49  ;;  %v2219_v53 = vpop.f32.mrb[31].mxu1  ;;  %2249 = vmatmul.mubr.bf16.vlgmr.msra.gmra.mrb[44].mxu0 %v792_v26 }
 0x48b   :  { %2252 = vmatprep.mubr.msk.bf16.mxu0 %vm2604_vm1, %v2603_v0 }
 0x48c   :  { %v774_v54 = vadd.bf16 %v769_v52, %v674_v8 }
 0x48e   :  { %v788_v55 = vadd.bf16 %v786_v43, %v774_v54 }
 0x48f   :  { %v745_v56 = vpop.f32.mrb[32].mxu1 }
 0x490   :  { %v2222_v62 = vpop.f32.mrb[33].mxu1  ;;  %v793_v1 = vmax.bf16 %v2606_v15, %v788_v55 }
 0x491   :  { %v748_v2 = vpop.f32.mrb[34].mxu1 }
 0x492   :  { %v770_v57 = vpack.c.bf16 %v748_v2, %v745_v56  ;;  %v2223_v58 = vpop.f32.mrb[35].mxu1  ;;  %2253 = vmatmul.mubr.bf16.gmra.mrb[48].mxu0 %v793_v1 }
 0x493   :  { %2256 = vmatprep.mubr.msk.bf16.mxu0 %vm2604_vm1, %v2603_v0 }
 0x494   :  { %v775_v59 = vadd.bf16 %v770_v57, %v675_v13 }
 0x496   :  { %v789_v60 = vadd.bf16 %v786_v43, %v775_v59 }
 0x497   :  { %v753_v61 = vpop.f32.mrb[36].mxu1 }
 0x498   :  { %v2226_v5 = vpop.f32.mrb[37].mxu1  ;;  %v794_v7 = vmax.bf16 %v2606_v15, %v789_v60 }
 0x499   :  { %v756_v8 = vpop.f32.mrb[38].mxu1 }
 0x49a   :  { %v771_v63 = vpack.c.bf16 %v756_v8, %v753_v61  ;;  %v2227_v4 = vpop.f32.mrb[39].mxu1  ;;  %2257 = vmatmul.mubr.bf16.gmra.mrb[52].mxu0 %v794_v7  ;;  %v2972_v8 = vld [vmem:[%s3109_s2 + $0x4] ss:$0 sm:$0xff] }
 0x49b   :  { %2260 = vmatprep.mubr.msk.bf16.mxu0 %vm2604_vm1, %v2603_v0 }
 0x49c   :  { %v776_v6 = vadd.bf16 %v771_v63, %v676_v22  ;;  %v2500_v22 = vld [vmem:[#allocation2 + $0xe0] sm:$0xff]  }
 0x49d   :  { %2283 = vmatpush3.bf16.msra.mxu1 %v2500_v22 }
 0x49e   :  { %v790_v18 = vadd.bf16 %v786_v43, %v776_v6 }
 0x49f   :  { %v761_v9 = vpop.f32.mrb[40].mxu1 }
 0x4a0   :  { %v2230_v10 = vpop.f32.mrb[41].mxu1  ;;  %v795_v12 = vmax.bf16 %v2606_v15, %v790_v18 }
 0x4a1   :  { %v764_v13 = vpop.f32.mrb[42].mxu1 }
 0x4a2   :  { %v772_v11 = vpack.c.bf16 %v764_v13, %v761_v9  ;;  %v2231_v14 = vpop.f32.mrb[43].mxu1  ;;  %2261 = vmatmul.mubr.bf16.gmra.mrb[56].mxu0 %v795_v12 }
 0x4a3   :  { %2264 = vmatprep.mubr.msk.bf16.mxu0 %vm2604_vm1, %v2603_v0 }
 0x4a4   :  { %v777_v19 = vadd.bf16 %v772_v11, %v677_v29 }
 0x4a6   :  { %v791_v23 = vadd.bf16 %v786_v43, %v777_v19 }
 0x4a8   :  { %v796_v17 = vmax.bf16 %v2606_v15, %v791_v23 }
 0x4aa   :  { %2265 = vmatmul.mubr.bf16.gmra.mrb[60].mxu0 %v796_v17 }
 0x4ab   :  { %2324 = vmatprep.mubr.msk.f32.mxu0 %vm429_vm11, %v2757_v46 }
 0x55d   :  { %v895_v27 = vpop.f32.mrb[44].mxu0 }
 0x55e   :  { %v2250_v29 = vpop.f32.mrb[45].mxu0 }
 0x55f   :  { %v898_v33 = vpop.f32.mrb[46].mxu0 }
 0x560   :  { %v934_v35 = vpack.c.bf16 %v898_v33, %v895_v27  ;;  %v2251_v36 = vpop.f32.mrb[47].mxu0 }
 0x562   :  { %v2939_v37 = vadd.bf16 %v947_v32, %v934_v35 }
 0x564   :  { %v963_v38 = vmax.bf16 %v2606_v15, %v2939_v37 }
 0x565   :  { %v903_v39 = vpop.f32.mrb[48].mxu0 }
 0x566   :  { %v2254_v40 = vpop.f32.mrb[49].mxu0  ;;  %2285 = vmatmul.mubr.bf16.vlgmr.msra.gmra.mrb[44].mxu1 %v963_v38 }
 0x567   :  { %v906_v16 = vpop.f32.mrb[50].mxu0  ;;  %2288 = vmatprep.mubr.msk.bf16.mxu1 %vm2604_vm1, %v2603_v0 }
 0x568   :  { %v935_v41 = vpack.c.bf16 %v906_v16, %v903_v39  ;;  %v2255_v42 = vpop.f32.mrb[51].mxu0 }
 0x56a   :  { %v2945_v43 = vadd.bf16 %v947_v32, %v935_v41 }
 0x56c   :  { %v964_v44 = vmax.bf16 %v2606_v15, %v2945_v43 }
 0x56d   :  { %v911_v45 = vpop.f32.mrb[52].mxu0 }
 0x56e   :  { %v2258_v48 = vpop.f32.mrb[53].mxu0  ;;  %2289 = vmatmul.mubr.bf16.gmra.mrb[48].mxu1 %v964_v44 }
 0x56f   :  { %v914_v49 = vpop.f32.mrb[54].mxu0  ;;  %2292 = vmatprep.mubr.msk.bf16.mxu1 %vm2604_vm1, %v2603_v0 }
 0x570   :  { %v936_v26 = vpack.c.bf16 %v914_v49, %v911_v45  ;;  %v2259_v50 = vpop.f32.mrb[55].mxu0 }
 0x572   :  { %v2951_v51 = vadd.bf16 %v947_v32, %v936_v26 }
 0x574   :  { %v965_v52 = vmax.bf16 %v2606_v15, %v2951_v51 }
 0x575   :  { %v919_v53 = vpop.f32.mrb[56].mxu0 }
 0x576   :  { %v2262_v54 = vpop.f32.mrb[57].mxu0  ;;  %2293 = vmatmul.mubr.bf16.gmra.mrb[52].mxu1 %v965_v52 }
 0x577   :  { %v922_v55 = vpop.f32.mrb[58].mxu0  ;;  %2296 = vmatprep.mubr.msk.bf16.mxu1 %vm2604_vm1, %v2603_v0 }
 0x578   :  { %v937_v56 = vpack.c.bf16 %v922_v55, %v919_v53  ;;  %v2263_v62 = vpop.f32.mrb[59].mxu0 }
 0x57a   :  { %v2957_v1 = vadd.bf16 %v947_v32, %v937_v56 }
 0x57c   :  { %v966_v2 = vmax.bf16 %v2606_v15, %v2957_v1 }
 0x57d   :  { %v927_v57 = vpop.f32.mrb[60].mxu0 }
 0x57e   :  { %v2266_v58 = vpop.f32.mrb[61].mxu0  ;;  %2297 = vmatmul.mubr.bf16.gmra.mrb[56].mxu1 %v966_v2 }
 0x57f   :  { %v930_v59 = vpop.f32.mrb[62].mxu0  ;;  %2300 = vmatprep.mubr.msk.bf16.mxu1 %vm2604_vm1, %v2603_v0 }
 0x580   :  { %v938_v60 = vpack.c.bf16 %v930_v59, %v927_v57  ;;  %v2267_v61 = vpop.f32.mrb[63].mxu0 }
 0x582   :  { %v2963_v5 = vadd.bf16 %v947_v32, %v938_v60 }
 0x584   :  { %v967_v7 = vmax.bf16 %v2606_v15, %v2963_v5 }
 0x586   :  { %2301 = vmatmul.mubr.bf16.gmra.mrb[60].mxu1 %v967_v7 }
 0x587   :  { %2347 = vmatprep.mubr.msk.f32.mxu1 %vm429_vm11, %v2757_v46 }
 0x639   :  { %v1071_v63 = vpop.f32.mrb[44].mxu1 }
 0x63a   :  { %v1072_v4 = vadd.f32 %v2972_v8, %v1071_v63  ;;  %v2286_v6 = vpop.f32.mrb[45].mxu1 }
 0x63b   :  { %v1074_v18 = vpop.f32.mrb[46].mxu1 }
 0x63c   :  { %v1110_v9 = vmul.f32 1.442695, %v1072_v4  ;;  %v1075_v10 = vadd.f32 %v2972_v8, %v1074_v18  ;;  %v2287_v12 = vpop.f32.mrb[47].mxu1  ;;  %vm1130_vm9 = vcmp.ne.f32.partialorder %v1072_v4, 0.0 }
 0x63d   :  { %v1953_v31 = vsel %vm1130_vm9, 1.0, %v2603_v0 }
 0x63e   :  { %2515 = vpow2.f32 %v1110_v9  ;;  %v1112_v13 = vmul.f32 1.442695, %v1075_v10  ;;  %vm1131_vm7 = vcmp.ne.f32.partialorder %v1075_v10, 0.0 }
 0x63f   :  { %v1954_v32 = vsel %vm1131_vm7, 1.0, %v2603_v0 }
 0x640   :  { %2517 = vpow2.f32 %v1112_v13 }
 0x641   :  { %v1079_v11 = vpop.f32.mrb[48].mxu1 }
 0x642   :  { %v1080_v46 = vadd.f32 %v2972_v8, %v1079_v11  ;;  %v2290_v14 = vpop.f32.mrb[49].mxu1 }
 0x643   :  { %v1082_v19 = vpop.f32.mrb[50].mxu1 }
 0x644   :  { %v1114_v23 = vmul.f32 1.442695, %v1080_v46  ;;  %v1083_v17 = vadd.f32 %v2972_v8, %v1082_v19  ;;  %v2291_v20 = vpop.f32.mrb[51].mxu1  ;;  %vm1132_vm8 = vcmp.ne.f32.partialorder %v1080_v46, 0.0 }
 0x645   :  { %v1955_v45 = vsel %vm1132_vm8, 1.0, %v2603_v0 }
 0x646   :  { %2519 = vpow2.f32 %v1114_v23  ;;  %v1116_v22 = vmul.f32 1.442695, %v1083_v17  ;;  %vm1133_vm10 = vcmp.ne.f32.partialorder %v1083_v17, 0.0 }
 0x647   :  { %v1956_v50 = vsel %vm1133_vm10, 1.0, %v2603_v0 }
 0x648   :  { %v2516_v25 = vpop.eup %2515  ;;  %2521 = vpow2.f32 %v1116_v22 }
 0x649   :  { %v1087_v24 = vpop.f32.mrb[52].mxu1  ;;  %v1160_v27 = vmul.f32 %v2516_v25, %v1953_v31 }
 0x64a   :  { %v2518_v29 = vpop.eup %2517  ;;  %v1088_v33 = vadd.f32 %v2972_v8, %v1087_v24  ;;  %v2294_v35 = vpop.f32.mrb[53].mxu1 }
 0x64b   :  { %v1161_v36 = vmul.f32 %v2518_v29, %v1954_v32  ;;  %1253 = vperm.xlu0 %2464, %v1160_v27   ;;  %v1090_v38 = vpop.f32.mrb[54].mxu1 }
 0x64c   :  { %v1118_v39 = vmul.f32 1.442695, %v1088_v33  ;;  %v1091_v40 = vadd.f32 %v2972_v8, %v1090_v38  ;;  %v2295_v16 = vpop.f32.mrb[55].mxu1  ;;  %vm1134_vm12 = vcmp.ne.f32.partialorder %v1088_v33, 0.0  ;;  %v2548_v38 = vld [vmem:[%s3107_s0 + $0x8] sm:$0xff]  }
 0x64d   :  { %v2414_v41 = vpack.c.bf16 %v1161_v36, %v1160_v27  ;;  %v1957_v60 = vsel %vm1134_vm12, 1.0, %v2603_v0  ;;  %v2550_v16 = vld [vmem:[%s3107_s0 + $0x18] sm:$0xff]  }
 0x64e   :  { %2523 = vpow2.f32 %v1118_v39  ;;  %v1120_v42 = vmul.f32 1.442695, %v1091_v40  ;;  %vm1135_vm13 = vcmp.ne.f32.partialorder %v1091_v40, 0.0  ;;  %v2549_v39 = vld [vmem:[%s3107_s0 + $0x10] sm:$0xff]   ;;  %v2467_v40 = vld [vmem:[#allocation2 + $0xe8] sm:$0x7f]  }
 0x64f   :  { %1258 = vperm.xlu0 %2464, %v1161_v36   ;;  %2415 = vmatprep.subr.bf16.mxu0 %v2414_v41  ;;  %v1958_v4 = vsel %vm1135_vm13, 1.0, %v2603_v0  ;;  %v2547_v36 = vld [vmem:[%s3107_s0] sm:$0xff]  }
 0x650   :  { %v2520_v44 = vpop.eup %2519  ;;  %2525 = vpow2.f32 %v1120_v42  ;;  %2417 = vmatpush3.bf16.msra.mxu0 %v2414_v41  ;;  %v1894_v41 = vsel %vm125_vm5, 1.0, %v2603_v0  ;;  %v1895_v42 = vsel %vm126_vm6, 1.0, %v2603_v0 }
 0x651   :  { %v1095_v48 = vpop.f32.mrb[56].mxu1  ;;  %v1162_v49 = vmul.f32 %v2520_v44, %v1955_v45  ;;  %v131_v44 = vpack.c.bf16 %v1895_v42, %v1894_v41  ;;  %v1461_v45 = vand.u32 %v2467_v40, %v2648_v3  ;;  %v954_v3 = vunpack.c.h.bf16 %v2939_v37  ;;  %v2505_v41 = vld [vmem:[#allocation2 + $0x110] sm:$0xff]   ;;  %v2506_v42 = vld [vmem:[#allocation2 + $0x118] sm:$0xff]  }
 0x652   :  { %v2522_v26 = vpop.eup %2521  ;;  %v1096_v52 = vadd.f32 %v2972_v8, %v1095_v48  ;;  %v2298_v53 = vpop.f32.mrb[57].mxu1  ;;  %v953_v48 = vunpack.c.l.bf16 %v2939_v37  ;;  %v958_v37 = vunpack.c.h.bf16 %v2951_v51 }
 0x653   :  { %v1163_v54 = vmul.f32 %v2522_v26, %v1956_v50  ;;  %1263 = vperm.xlu1 %2465, %v1162_v49   ;;  %v1098_v55 = vpop.f32.mrb[58].mxu1 }
 0x654   :  { %v1122_v56 = vmul.f32 1.442695, %v1096_v52  ;;  %v1099_v62 = vadd.f32 %v2972_v8, %v1098_v55  ;;  %v2299_v2 = vpop.f32.mrb[59].mxu1  ;;  %vm1136_vm14 = vcmp.ne.f32.partialorder %v1096_v52, 0.0  ;;  %v956_v55 = vunpack.c.h.bf16 %v2945_v43 }
 0x655   :  { %v2418_v57 = vpack.c.bf16 %v1163_v54, %v1162_v49  ;;  %v1959_v23 = vsel %vm1136_vm14, 1.0, %v2603_v0 }
 0x656   :  { %2527 = vpow2.f32 %v1122_v56  ;;  %v1124_v58 = vmul.f32 1.442695, %v1099_v62  ;;  %vm1137_vm15 = vcmp.ne.f32.partialorder %v1099_v62, 0.0 }
 0x657   :  { %1268 = vperm.xlu1 %2465, %v1163_v54   ;;  %2419 = vmatprep.subr.bf16.mxu0 %v2418_v57  ;;  %v1960_v22 = vsel %vm1137_vm15, 1.0, %v2603_v0  ;;  %v955_v54 = vunpack.c.l.bf16 %v2945_v43  ;;  %v959_v43 = vunpack.c.l.bf16 %v2957_v1 }
 0x658   :  { %v2524_v59 = vpop.eup %2523  ;;  %2529 = vpow2.f32 %v1124_v58  ;;  %2421 = vmatpush3.bf16.msra.mxu0 %v2418_v57 }
 0x659   :  { %v1103_v61 = vpop.f32.mrb[60].mxu1  ;;  %v1164_v7 = vmul.f32 %v2524_v59, %v1957_v60  ;;  %v957_v59 = vunpack.c.l.bf16 %v2951_v51  ;;  %v961_v51 = vunpack.c.l.bf16 %v2963_v5 }
 0x65a   :  { %v2526_v63 = vpop.eup %2525  ;;  %v1104_v6 = vadd.f32 %v2972_v8, %v1103_v61  ;;  %v2302_v18 = vpop.f32.mrb[61].mxu1 }
 0x65b   :  { %1273 = vperm.xlu0 %2464, %v1164_v7   ;;  %v1106_v9 = vpop.f32.mrb[62].mxu1  ;;  %v1165_v10 = vmul.f32 %v2526_v63, %v1958_v4 }
 0x65c   :  { %v1126_v12 = vmul.f32 1.442695, %v1104_v6  ;;  %v1107_v13 = vadd.f32 %v2972_v8, %v1106_v9  ;;  %v2303_v11 = vpop.f32.mrb[63].mxu1  ;;  %vm1138_vm0 = vcmp.ne.f32.partialorder %v1104_v6, 0.0  ;;  %v960_v6 = vunpack.c.h.bf16 %v2957_v1 }
 0x65d   :  { %1278 = vperm.xlu1 %2465, %v1165_v10   ;;  %v2422_v46 = vpack.c.bf16 %v1165_v10, %v1164_v7  ;;  %v1961_v24 = vsel %vm1138_vm0, 1.0, %v2603_v0  ;;  %v962_v11 = vunpack.c.h.bf16 %v2963_v5 }
 0x65e   :  { %2531 = vpow2.f32 %v1126_v12  ;;  %v1128_v14 = vmul.f32 1.442695, %v1107_v13  ;;  %vm1139_vm2 = vcmp.ne.f32.partialorder %v1107_v13, 0.0 }
 0x65f   :  { %2423 = vmatprep.subr.bf16.mxu0 %v2422_v46  ;;  %v1962_v32 = vsel %vm1139_vm2, 1.0, %v2603_v0 }
 0x660   :  { %v2528_v19 = vpop.eup %2527  ;;  %2533 = vpow2.f32 %v1128_v14  ;;  %2425 = vmatpush3.bf16.msra.mxu0 %v2422_v46 }
 0x661   :  { %v1166_v17 = vmul.f32 %v2528_v19, %v1959_v23 }
 0x662   :  { %v2530_v20 = vpop.eup %2529 }
 0x663   :  { %1283 = vperm.xlu0 %2464, %v1166_v17   ;;  %v1167_v25 = vmul.f32 %v2530_v20, %v1960_v22 }
 0x665   :  { %1288 = vperm.xlu1 %2465, %v1167_v25   ;;  %v2426_v8 = vpack.c.bf16 %v1167_v25, %v1166_v17  ;;  %v2501_v17 = vld [vmem:[#allocation2 + $0xf0] sm:$0xff]   ;;  %v2502_v25 = vld [vmem:[#allocation2 + $0xf8] sm:$0xff]  }
 0x667   :  { %2427 = vmatprep.subr.bf16.mxu0 %v2426_v8 }
 0x668   :  { %v2532_v31 = vpop.eup %2531  ;;  %2429 = vmatpush3.bf16.msra.mxu0 %v2426_v8 }
 0x669   :  { %v1168_v27 = vmul.f32 %v2532_v31, %v1961_v24 }
 0x66a   :  { %v2534_v29 = vpop.eup %2533 }
 0x66b   :  { %1293 = vperm.xlu0 %2464, %v1168_v27   ;;  %v1169_v33 = vmul.f32 %v2534_v29, %v1962_v32 }
 0x66d   :  { %1298 = vperm.xlu1 %2465, %v1169_v33   ;;  %v2430_v35 = vpack.c.bf16 %v1169_v33, %v1168_v27 }
 0x66f   :  { %2431 = vmatprep.subr.bf16.mxu0 %v2430_v35 }
 0x670   :  { %2433 = vmatpush3.bf16.msra.mxu0 %v2430_v35 }
 0x671   :  { %2350 = vmatprep.subr.bf16.mxu0 %v2603_v0 }
 0x673   :  { %2325 = vmatmul.mubr.msk.f32.vlgmr.msra.gmra.mrb[64].mxu0 %vm429_vm11, %v2760_v47 }
 0x674   :  { %2351 = vmatpush3.bf16.msra.mxu0 %v2547_v36  ;;  %2360 = vmatprep.mubr.msk.bf16.mxu0 %vm2604_vm1, %v2603_v0 }
 0x675   :  { %2352 = vmatprep.subr.bf16.mxu0 %v2603_v0 }
 0x678   :  { %2353 = vmatpush3.bf16.msra.mxu0 %v2548_v38 }
 0x679   :  { %2354 = vmatprep.subr.bf16.mxu0 %v2603_v0 }
 0x67c   :  { %2355 = vmatpush3.bf16.msra.mxu0 %v2549_v39  ;;  %v2503_v39 = vld [vmem:[#allocation2 + $0x100] sm:$0xff]  }
 0x67d   :  { %2356 = vmatprep.subr.bf16.mxu0 %v2603_v0 }
 0x680   :  { %2357 = vmatpush3.bf16.msra.mxu0 %v2550_v16  ;;  %v2504_v16 = vld [vmem:[#allocation2 + $0x108] sm:$0xff]  }
 0x681   :  { %2358 = vmatprep.subr.bf16.mxu0 %v2603_v0 }
 0x684   :  { %2359 = vmatpush3.bf16.msra.mxu0 %v2551_v28 }
 0x685   :  { %2364 = vmatprep.subr.bf16.mxu0 %v2603_v0 }
 0x687   :  { %2361 = vmatmul.mubr.msk.bf16.vlgmr.msra.gmra.mrb[68].mxu0 %vm429_vm11, %v131_v44 }
 0x688   :  { %2365 = vmatpush3.bf16.msra.mxu0 %v1461_v45  ;;  %2366 = vmatprep.mubr.msk.bf16.mxu0 %vm2604_vm1, %v2603_v0 }
 0x689   :  { %2390 = vmatprep.subr.bf16.mxu0 %v2603_v0 }
 0x6ca   :  { %v1254_v30 = vpop.permute.xlu0 %1253 }
 0x6cb   :  { %v1301_v26 = vmul.f32 %v1254_v30, %v953_v48 }
 0x6ce   :  { %v1259_v49 = vpop.permute.xlu0 %1258 }
 0x6cf   :  { %v1302_v50 = vmul.f32 %v1259_v49, %v954_v3  ;;  %v2507_v3 = vld [vmem:[#allocation2 + $0x120] sm:$0xff]   ;;  %v2508_v49 = vld [vmem:[#allocation2 + $0x128] sm:$0xff]  }
 0x6d1   :  { %v2434_v52 = vpack.c.bf16 %v1302_v50, %v1301_v26  ;;  %v1569_v26 = vld [vmem:[%s3109_s2 + $0x5] sm:$0x1] }
 0x6d2   :  { %v1264_v53 = vpop.permute.xlu1 %1263  ;;  %v1570_v50 = vpack.c.bf16 %v1569_v26, %v1569_v26 }
 0x6d3   :  { %2435 = vmatprep.subr.bf16.mxu1 %v2434_v52  ;;  %v1303_v62 = vmul.f32 %v1264_v53, %v955_v54 }
 0x6d4   :  { %2437 = vmatpush3.bf16.msra.mxu1 %v2434_v52  ;;  %v1572_v52 = vpack.i.b16 %v1570_v50, %v1570_v50 }
 0x6d6   :  { %v1269_v56 = vpop.permute.xlu1 %1268 }
 0x6d7   :  { %v1304_v2 = vmul.f32 %v1269_v56, %v956_v55 }
 0x6d9   :  { %v2438_v57 = vpack.c.bf16 %v1304_v2, %v1303_v62  ;;  %v1577_v62 = vrot.slane %v1572_v52, %v2695_v21 }
 0x6da   :  { %v1274_v58 = vpop.permute.xlu0 %1273 }
 0x6db   :  { %2439 = vmatprep.subr.bf16.mxu1 %v2438_v57  ;;  %v1305_v61 = vmul.f32 %v1274_v58, %v957_v59 }
 0x6dc   :  { %2441 = vmatpush3.bf16.msra.mxu1 %v2438_v57  ;;  %v1279_v60 = vpop.permute.xlu1 %1278 }
 0x6dd   :  { %v1306_v7 = vmul.f32 %v1279_v60, %v958_v37  ;;  %v2509_v37 = vld [vmem:[#allocation2 + $0x130] sm:$0xff]   ;;  %v2510_v60 = vld [vmem:[#allocation2 + $0x138] sm:$0xff]  }
 0x6df   :  { %v2442_v63 = vpack.c.bf16 %v1306_v7, %v1305_v61  ;;  %v2511_v61 = vld [vmem:[#allocation2 + $0x140] sm:$0xff]   ;;  %v2512_v7 = vld [vmem:[#allocation2 + $0x148] sm:$0xff]  }
 0x6e1   :  { %2443 = vmatprep.subr.bf16.mxu1 %v2442_v63 }
 0x6e2   :  { %2445 = vmatpush3.bf16.msra.mxu1 %v2442_v63  ;;  %v1284_v4 = vpop.permute.xlu0 %1283  ;;  %v1657_v63 = vld [vmem:[%s3109_s2 + $0x6] sm:$0x1] }
 0x6e3   :  { %v1307_v9 = vmul.f32 %v1284_v4, %v959_v43  ;;  %v1658_v4 = vpack.c.bf16 %v1657_v63, %v1657_v63 }
 0x6e4   :  { %v1289_v18 = vpop.permute.xlu1 %1288 }
 0x6e5   :  { %v1308_v10 = vmul.f32 %v1289_v18, %v960_v6  ;;  %v1660_v43 = vpack.i.b16 %v1658_v4, %v1658_v4 }
 0x6e7   :  { %v2446_v12 = vpack.c.bf16 %v1308_v10, %v1307_v9  ;;  %v1665_v9 = vrot.slane %v1660_v43, %v2695_v21 }
 0x6e9   :  { %2447 = vmatprep.subr.bf16.mxu1 %v2446_v12 }
 0x6ea   :  { %2449 = vmatpush3.bf16.msra.mxu1 %v2446_v12  ;;  %v1294_v13 = vpop.permute.xlu0 %1293 }
 0x6eb   :  { %v1309_v14 = vmul.f32 %v1294_v13, %v961_v51 }
 0x6ec   :  { %v1299_v46 = vpop.permute.xlu1 %1298 }
 0x6ed   :  { %v1310_v19 = vmul.f32 %v1299_v46, %v962_v11  ;;  %v2513_v46 = vld [vmem:[#allocation2 + $0x150] sm:$0xff]  }
 0x6ef   :  { %v2450_v23 = vpack.c.bf16 %v1310_v19, %v1309_v14  ;;  %v2514_v14 = vld [vmem:[#allocation2 + $0x158] sm:$0xff]   ;;  %v1745_v19 = vld [vmem:[%s3109_s2 + $0x7] sm:$0x1] }
 0x6f1   :  { %2451 = vmatprep.subr.bf16.mxu1 %v2450_v23 }
 0x6f2   :  { %2453 = vmatpush3.bf16.msra.mxu1 %v2450_v23  ;;  %v1746_v23 = vpack.c.bf16 %v1745_v19, %v1745_v19 }
 0x6f3   :  { %2370 = vmatprep.subr.bf16.mxu1 %v2603_v0 }
 0x6f5   :  { %2348 = vmatmul.mubr.msk.f32.vlgmr.msra.gmra.mrb[64].mxu1 %vm429_vm11, %v2760_v47  ;;  %vm1522_vm11 = vcmask 261120  }
 0x6f6   :  { %2371 = vmatpush3.bf16.msra.mxu1 %v2501_v17  ;;  %2374 = vmatprep.mubr.msk.bf16.mxu1 %vm2604_vm1, %v2603_v0  ;;  %v1748_v17 = vpack.i.b16 %v1746_v23, %v1746_v23 }
 0x6f7   :  { %2372 = vmatprep.subr.bf16.mxu1 %v2603_v0 }
 0x6fa   :  { %2373 = vmatpush3.bf16.msra.mxu1 %v2502_v25 }
 0x6fb   :  { %2378 = vmatprep.subr.bf16.mxu1 %v2603_v0 }
 0x746   :  { %v2326_v1 = vpop.f32.mrb[64].mxu0 }
 0x747   :  { %2535 = vrcp.f32 %v2326_v1  ;;  %v1242_v5 = vpop.f32.mrb[65].mxu0 }
 0x748   :  { %2537 = vrcp.f32 %v1242_v5 }
 0x751   :  { %v2536_v20 = vpop.eup %2535 }
 0x752   :  { %v2538_v22 = vpop.eup %2537  ;;  %1395 = vperm.xlu1 %2465, %v2536_v20   ;;  %v1753_v20 = vrot.slane %v1748_v17, %v2695_v21 }
 0x753   :  { %1390 = vperm.xlu0 %2464, %v2538_v22  }
 0x75a   :  { %v1442_v8 = vpop.f32.mrb[68].mxu0 }
 0x75b   :  { %v2362_v47 = vpop.f32.mrb[69].mxu0 }
 0x75c   :  { %v1445_v31 = vpop.f32.mrb[70].mxu0 }
 0x75d   :  { %v1449_v24 = vpack.c.bf16 %v1445_v31, %v1442_v8  ;;  %v2363_v27 = vpop.f32.mrb[71].mxu0 }
 0x75f   :  { %2367 = vmatmul.mubr.msk.bf16.vlgmr.msra.gmra.mrb[72].mxu0 %vm164_vm3, %v1449_v24  ;;  %vm1858_vm3 = vcmp.eq.s32.totalorder %v2744_v34, 13 }
 0x760   :  { %2398 = vmatprep.mubr.msk.bf16.mxu0 %vm2604_vm1, %v2603_v0  ;;  %2391 = vmatpush3.bf16.msra.mxu0 %v2507_v3 }
 0x761   :  { %2392 = vmatprep.subr.bf16.mxu0 %v2603_v0 }
 0x764   :  { %2393 = vmatpush3.bf16.msra.mxu0 %v2508_v49 }
 0x765   :  { %2394 = vmatprep.subr.bf16.mxu0 %v2603_v0 }
 0x768   :  { %2395 = vmatpush3.bf16.msra.mxu0 %v2509_v37 }
 0x769   :  { %2396 = vmatprep.subr.bf16.mxu0 %v2603_v0 }
 0x76c   :  { %2397 = vmatpush3.bf16.msra.mxu0 %v2510_v60 }
 0x7c8   :  { %v2349_v29 = vpop.f32.mrb[64].mxu1 }
 0x7c9   :  { %v1377_v32 = vpop.f32.mrb[65].mxu1 }
 0x7d1   :  { %v1396_v33 = vpop.permute.xlu1 %1395 }
 0x7d2   :  { %v1399_v35 = vmul.f32 %v2349_v29, %v1396_v33  ;;  %v1391_v36 = vpop.permute.xlu0 %1390 }
 0x7d3   :  { %v1398_v38 = vmul.f32 %v1391_v36, %v1377_v32 }
 0x7d5   :  { %v1505_v40 = vpack.c.bf16 %v1399_v35, %v1398_v38 }
 0x7d7   :  { %2375 = vmatmul.mubr.msk.bf16.vlgmr.msra.gmra.mrb[68].mxu1 %vm1522_vm11, %v1505_v40 }
 0x7d8   :  { %2379 = vmatpush3.bf16.msra.mxu1 %v2503_v39  ;;  %2386 = vmatprep.mubr.msk.bf16.mxu1 %vm2604_vm1, %v2603_v0 }
 0x7d9   :  { %2380 = vmatprep.subr.bf16.mxu1 %v2603_v0 }
 0x7dc   :  { %2381 = vmatpush3.bf16.msra.mxu1 %v2504_v16 }
 0x7dd   :  { %2382 = vmatprep.subr.bf16.mxu1 %v2603_v0 }
 0x7e0   :  { %2383 = vmatpush3.bf16.msra.mxu1 %v2505_v41 }
 0x7e1   :  { %2384 = vmatprep.subr.bf16.mxu1 %v2603_v0 }
 0x7e4   :  { %2385 = vmatpush3.bf16.msra.mxu1 %v2506_v42 }
 0x7e5   :  { %2402 = vmatprep.subr.bf16.mxu1 %v2603_v0 }
 0x832   :  { %v1497_v44 = vpop.f32.mrb[72].mxu0 }
 0x833   :  { %v2368_v45 = vpop.f32.mrb[73].mxu0 }
 0x834   :  { %v1500_v28 = vpop.f32.mrb[74].mxu0 }
 0x835   :  { %v1504_v30 = vpack.c.bf16 %v1500_v28, %v1497_v44  ;;  %v2369_v48 = vpop.f32.mrb[75].mxu0 }
 0x8aa   :  { %v1560_v53 = vpop.f32.mrb[68].mxu1 }
 0x8ab   :  { %v2376_v54 = vpop.f32.mrb[69].mxu1 }
 0x8ac   :  { %v1563_v55 = vpop.f32.mrb[70].mxu1 }
 0x8ad   :  { %v1567_v56 = vpack.c.bf16 %v1563_v55, %v1560_v53  ;;  %v2377_v2 = vpop.f32.mrb[71].mxu1 }
 0x8af   :  { %v1568_v57 = vadd.bf16 %v1567_v56, %v1504_v30 }
 0x8b1   :  { %v1578_v58 = vadd.bf16 %v1577_v62, %v1568_v57 }
 0x8b3   :  { %v1579_v59 = vmax.bf16 %v2606_v15, %v1578_v58 }
 0x8b5   :  { %2387 = vmatmul.mubr.msk.bf16.vlgmr.msra.gmra.mrb[72].mxu1 %vm316_vm4, %v1579_v59 }
 0x8b6   :  { %2410 = vmatprep.mubr.msk.bf16.mxu1 %vm2604_vm1, %v2603_v0  ;;  %2403 = vmatpush3.bf16.msra.mxu1 %v2511_v61  ;;  %vm1837_vm1 = vcmp.lt.s32.totalorder %v2744_v34, 13 }
 0x8b7   :  { %2404 = vmatprep.subr.bf16.mxu1 %v2603_v0 }
 0x8ba   :  { %2405 = vmatpush3.bf16.msra.mxu1 %v2512_v7 }
 0x8bb   :  { %2406 = vmatprep.subr.bf16.mxu1 %v2603_v0 }
 0x8be   :  { %2407 = vmatpush3.bf16.msra.mxu1 %v2513_v46 }
 0x8bf   :  { %2408 = vmatprep.subr.bf16.mxu1 %v2603_v0  ;;  %v1983_v0 = vld [vmem:[%s3109_s2 + $0x8] ss:$0 sm:$0xff]  ;;  %s2607_s2 = smov [#allocation5]  }
 0x8c0   :  { %s1870_s7 = sshll.u32 %s2607_s2, 4  ;;  %s1871_s7 = int_to_ptr.vmem [resolvable:$true] %s1870_s7 }
 0x8c1   :  { %s2574_s8 = scalar_lea.vmem %s1871_s7, 256  ;;  %p2579_p9 = scmp.lt.s32.totalorder %s1871_s7, %s1871_s7 }
 0x8c2   :  { %2409 = vmatpush3.bf16.msra.mxu1 %v2514_v14  ;;  %p2575_p8 = scmp.ne.s32.totalorder %s1871_s7, %s2574_s8  ;;  %p2580_p10 = scmp.lt.s32.totalorder %s2574_s8, %s2574_s8 }
 0x8c4   :  { %p2581_p11 = por %p2580_p10, %p2579_p9 }
 0x8c6   :  { %p2582_p12 = pnand %p2581_p11, %p2575_p8 }
 0x988   :  { %v1649_v6 = vpop.f32.mrb[72].mxu1 }
 0x989   :  { %v2388_v18 = vpop.f32.mrb[73].mxu1 }
 0x98a   :  { %v1652_v10 = vpop.f32.mrb[74].mxu1 }
 0x98b   :  { %v1656_v12 = vpack.c.bf16 %v1652_v10, %v1649_v6  ;;  %v2389_v13 = vpop.f32.mrb[75].mxu1 }
 0x98d   :  { %v1666_v51 = vadd.bf16 %v1665_v9, %v1656_v12 }
 0x98f   :  { %v1667_v11 = vmax.bf16 %v2606_v15, %v1666_v51 }
 0x991   :  { %2399 = vmatmul.mubr.msk.bf16.vlgmr.msra.gmra.mrb[76].mxu0 %vm316_vm4, %v1667_v11 }
 0xa64   :  { %v1737_v1 = vpop.f32.mrb[76].mxu0 }
 0xa65   :  { %v2400_v5 = vpop.f32.mrb[77].mxu0 }
 0xa66   :  { %v1740_v22 = vpop.f32.mrb[78].mxu0 }
 0xa67   :  { %v1744_v25 = vpack.c.bf16 %v1740_v22, %v1737_v1  ;;  %v2401_v8 = vpop.f32.mrb[79].mxu0 }
 0xa69   :  { %v1754_v47 = vadd.bf16 %v1753_v20, %v1744_v25 }
 0xa6b   :  { %v1755_v31 = vmax.bf16 %v2606_v15, %v1754_v47 }
 0xa6d   :  { %2411 = vmatmul.mubr.msk.bf16.vlgmr.msra.gmra.mrb[76].mxu1 %vm316_vm4, %v1755_v31 }
 0xb40   :  { %v1830_v24 = vpop.f32.mrb[76].mxu1 }
 0xb41   :  { %v1831_v27 = vadd.f32 %v1983_v0, %v1830_v24  ;;  %v2412_v29 = vpop.f32.mrb[77].mxu1 }
 0xb42   :  { %v1833_v32 = vpop.f32.mrb[78].mxu1 }
 0xb43   :  { %v1834_v33 = vadd.f32 %v1983_v0, %v1833_v32  ;;  %v2413_v21 = vpop.f32.mrb[79].mxu1  ;;  %v1838_v35 = vsel %vm1837_vm1, %v1831_v27, -inf  ;;  %v1859_v3 = vsel %vm1858_vm3, %v1831_v27, 0.0 }
 0xb44   :  { %1840 = vmax.xlane.f32.xlu0 %v1838_v35 }
 0xb45   :  { %v1839_v15 = vsel %vm1837_vm1, %v1834_v33, -inf  ;;  %v1860_v52 = vsel %vm1858_vm3, %v1834_v33, 0.0 }
 0xb46   :  { %1842 = vmax.xlane.f32.xlu1 %v1839_v15 }
 0xbd1   :  { %v1841_v36 = vpop.xlane.xlu0 %1840 }
 0xbd2   :  { %v1844_v38 = vsub.f32 %v1838_v35, %v1841_v36 }
 0xbd3   :  { %v1843_v39 = vpop.xlane.xlu1 %1842 }
 0xbd4   :  { %v1846_v40 = vmul.f32 1.442695, %v1844_v38  ;;  %v1845_v16 = vsub.f32 %v1839_v15, %v1843_v39 }
 0xbd6   :  { %2539 = vpow2.f32 %v1846_v40  ;;  %v1848_v41 = vmul.f32 1.442695, %v1845_v16 }
 0xbd8   :  { %2541 = vpow2.f32 %v1848_v41 }
 0xbe0   :  { %v2540_v42 = vpop.eup %2539 }
 0xbe1   :  { %1850 = vadd.xlane.f32.xlu0 %v2540_v42 }
 0xbe2   :  { %v2542_v44 = vpop.eup %2541 }
 0xbe5   :  { %1852 = vadd.xlane.f32.xlu0 %v2542_v44 }
 0xc6e   :  { %v1851_v45 = vpop.xlane.xlu0 %1850 }
 0xc6f   :  { %2543 = vrcp.f32 %v1851_v45 }
 0xc72   :  { %v1853_v28 = vpop.xlane.xlu0 %1852 }
 0xc73   :  { %2545 = vrcp.f32 %v1853_v28 }
 0xc79   :  { %v2544_v30 = vpop.eup %2543 }
 0xc7a   :  { %v1856_v48 = vmul.f32 %v2544_v30, %v2540_v42 }
 0xc7c   :  { %v1861_v49 = vsel %vm1837_vm1, %v1856_v48, %v1859_v3 }
 0xc7d   :  { %v2546_v26 = vpop.eup %2545  ;;  %1863 = vst [vmem:[#allocation5] sm:$0xff] %v1861_v49 }
 0xc7e   :  { %v1857_v50 = vmul.f32 %v2546_v26, %v2542_v44 }
 0xc80   :  { %v1862_v53 = vsel %vm1837_vm1, %v1857_v50, %v1860_v52 }
 0xc81   :  { %1864 = vst [vmem:[#allocation5 + $0x8] sm:$0xff] %v1862_v53 }
 0xc82   :  { %2585 = shalt.err (!%p2582_p12)
}
 0xc83   :  { %s2586_s11 = scalar_lea.hbm %s3110_s3, 256 }
 0xc84   :  { %p2587_p13 = scmp.ne.s32.totalorder %s3110_s3, %s2586_s11  ;;  %p2590_p0 = scmp.lt.u32.totalorder %s2586_s11, %s3110_s3 }
 0xc86   :  { %p2592_p1 = pnand %p2590_p0, %p2587_p13 }
 0xc88   :  { %2595 = shalt.err (!%p2592_p1)
}
 0xc89   :  { %s2608_s16 = smov 128   ;;  %s2609_s17 = smov 8  }
 0xc8a   :  { %1876 = dma.vmem_to_hbm [thread:$0]  %s1871_s7, 256, %s3110_s3, [#allocation4], %s2608_s16, %s2608_s16, %s2609_s17  }
 0xc8b   :  { %2598 = dma.done.wait [#allocation4], 256  }
 0xc8c   :  { %2599 = vsyncadd [#allocation4], 4294967040 }
 0xc8d   :  { %1880 = vsyncpa [#allocation3], 1 }
 0xc8e   :  { %1881 = vsyncpa [#allocation4], 1 }

</bundles_post_ra>
